<compile_context>
chip_gen: v7x
topology: tpu7x:2x2x1
jax: 0.10.0
libtpu: 0.0.40
codegen_flags: <defaults>
</compile_context>

<pallas_src>
import jax
import jax.numpy as jnp
from jax.experimental import pallas as pl
from jax.experimental.pallas import tpu as pltpu


def _dwconv_kernel(x_ref, xup_ref, xdn_ref, w_ref, b_ref, o_ref):
    """One (batch, channel-block, row-tile) step of the depthwise 3x3 conv.

    x_ref  : (1, th, W, Ct)  row tile of the input
    xup_ref: (1, 1,  W, Ct)  row just above the tile (clamped at the top edge)
    xdn_ref: (1, 1,  W, Ct)  row just below the tile (clamped at the bottom edge)
    w_ref  : (3, 3, Ct)      depthwise taps
    b_ref  : (1, Ct)         bias
    o_ref  : (1, th, W, Ct)  output row tile
    """
    h = pl.program_id(2)
    n_h = pl.num_programs(2)
    _, th, W, Ct = o_ref.shape
    f32 = jnp.float32

    # Halo rows, zeroed at the image border via a scalar multiplicative mask.
    up_valid = (h > 0).astype(f32)
    dn_valid = (h < n_h - 1).astype(f32)
    up = xup_ref[0].astype(f32) * up_valid          # (1, W, Ct)
    dn = xdn_ref[0].astype(f32) * dn_valid          # (1, W, Ct)
    center = x_ref[0].astype(f32)                   # (th, W, Ct)  single f32 cast

    # Row slab = image rows [h*th - 1, h*th + th] with zeros outside the image.
    xs = jnp.concatenate([up, center, dn], axis=0)  # (th + 2, W, Ct)

    # Column-shifted variants for the three horizontal taps (zero border along W),
    # built once per tile (3 shifts total, not 9).
    zcol = jnp.zeros((th + 2, 1, Ct), f32)
    shifted = (
        jnp.concatenate([zcol, xs[:, : W - 1, :]], axis=1),  # dx = 0 -> input col j-1
        xs,                                                  # dx = 1 -> input col j
        jnp.concatenate([xs[:, 1:, :], zcol], axis=1),       # dx = 2 -> input col j+1
    )

    acc = jnp.zeros((th, W, Ct), f32)
    for dx in range(3):
        s = shifted[dx]
        for dy in range(3):
            # Offsets along the leading (non-tiled) axis are cheap slices.
            acc = acc + s[dy:dy + th, :, :] * w_ref[dy, dx, :].astype(f32)
    acc = acc + b_ref[0].astype(f32)
    o_ref[0] = acc.astype(o_ref.dtype)


def _pick_row_tile(H, W, Ct, itemsize, max_rows=256, vmem_budget=16 * 1024 * 1024):
    """Largest divisor of H (<= max_rows) whose working set fits a small VMEM budget.

    Sized so double-buffered in/out blocks plus the f32 working slabs stay well
    below the scoped-VMEM limit on every generation (v7x: 64 MiB per TC).
    """
    best = 1
    for th in range(1, min(H, max_rows) + 1):
        if H % th:
            continue
        io_bytes = 2 * 2 * th * W * Ct * itemsize     # double-buffered in + out blocks
        work_bytes = 5 * (th + 2) * W * Ct * 4        # f32 slab + shifted copies + acc
        if io_bytes + work_bytes <= vmem_budget:
            best = th
    return best


def dwconv_nhwc_pallas(x_nhwc, w_hw_c, bias, *, row_tile=None):
    """Depthwise 3x3 conv, stride 1, pad 1, NHWC layout.

    x_nhwc: (N, H, W, C); w_hw_c: (3, 3, C); bias: (C,).  Returns (N, H, W, C).
    """
    N, H, W, C = x_nhwc.shape
    assert w_hw_c.shape == (3, 3, C)
    assert bias.shape == (C,)

    # Lane-dense channel blocking: 128 lanes per block when C allows it.
    # (Callers with large C not divisible by 128 should pad channels once outside.)
    Ct = 128 if C % 128 == 0 else C
    nC = C // Ct

    itemsize = jnp.dtype(x_nhwc.dtype).itemsize
    th = _pick_row_tile(H, W, Ct, itemsize) if row_tile is None else int(row_tile)
    assert H % th == 0, f"row_tile {th} must divide H={H}"
    nH = H // th

    b_2d = bias.reshape(1, C)

    kernel = pl.pallas_call(
        _dwconv_kernel,
        out_shape=jax.ShapeDtypeStruct((N, H, W, C), x_nhwc.dtype),
        grid_spec=pltpu.PrefetchScalarGridSpec(
            num_scalar_prefetch=0,
            grid=(N, nC, nH),
            in_specs=[
                # Center row tile.
                pl.BlockSpec((1, th, W, Ct), lambda n, c, h: (n, h, 0, c)),
                # 1-row halo above (block size 1 along H -> block index == row index),
                # clamped at the top edge (kernel masks it to zero when h == 0).
                pl.BlockSpec((1, 1, W, Ct),
                             lambda n, c, h: (n, jnp.maximum(h * th - 1, 0), 0, c)),
                # 1-row halo below, clamped at the bottom edge.
                pl.BlockSpec((1, 1, W, Ct),
                             lambda n, c, h: (n, jnp.minimum(h * th + th, H - 1), 0, c)),
                # Depthwise taps and bias: resident per channel block.
                pl.BlockSpec((3, 3, Ct), lambda n, c, h: (0, 0, c)),
                pl.BlockSpec((1, Ct), lambda n, c, h: (0, c)),
            ],
            out_specs=pl.BlockSpec((1, th, W, Ct), lambda n, c, h: (n, h, 0, c)),
        ),
        compiler_params=pltpu.CompilerParams(
            dimension_semantics=("parallel", "parallel", "parallel"),
            vmem_limit_bytes=48 * 1024 * 1024,
        ),
        cost_estimate=pl.CostEstimate(
            flops=18 * N * H * W * C,
            transcendentals=0,
            bytes_accessed=2 * N * H * W * C * itemsize,
        ),
    )
    # x is passed three times: once for the row tile, twice for the 1-row halos.
    return kernel(x_nhwc, x_nhwc, x_nhwc, w_hw_c, b_2d)


def dwconv_pallas(x_nchw, weight, bias, *, row_tile=None):
    """Matches nn.Conv2d(dim, dim, 3, 1, 1, groups=dim, bias=True) on NCHW input.

    The NCHW<->NHWC transposes exist only to mirror the PyTorch interface; in an
    NHWC model call dwconv_nhwc_pallas directly so they disappear from the hot path.
    """
    x_nhwc = jnp.transpose(x_nchw, (0, 2, 3, 1))
    w_hw_c = jnp.transpose(weight[:, 0, :, :], (1, 2, 0))   # (C,1,3,3) -> (3,3,C)
    out_nhwc = dwconv_nhwc_pallas(x_nhwc, w_hw_c, bias, row_tile=row_tile)
    return jnp.transpose(out_nhwc, (0, 3, 1, 2))


def _reference_dwconv(x_nchw, weight, bias):
    # Pure-JAX reference (depthwise conv via feature_group_count), f32, exact precision.
    out = jax.lax.conv_general_dilated(
        x_nchw.astype(jnp.float32), weight.astype(jnp.float32),
        window_strides=(1, 1),
        padding=((1, 1), (1, 1)),
        dimension_numbers=("NCHW", "OIHW", "NCHW"),
        feature_group_count=x_nchw.shape[1],
        precision=jax.lax.Precision.HIGHEST,
    )
    return out + bias.astype(jnp.float32).reshape(1, -1, 1, 1)


if __name__ == "__main__":
    key = jax.random.PRNGKey(0)
    k_x, k_w, k_b, k_x2 = jax.random.split(key, 4)

    # --- f32, small shape: single-tile and multi-tile (halo) paths -----------
    N, C, H, W = 2, 4, 16, 16
    x = jax.random.normal(k_x, (N, C, H, W), dtype=jnp.float32)
    fan_in = 1 * 3 * 3
    bound = 1.0 / (fan_in ** 0.5)
    weight = jax.random.uniform(k_w, (C, 1, 3, 3), jnp.float32, -bound, bound)
    bias = jax.random.uniform(k_b, (C,), jnp.float32, -bound, bound)

    ref = _reference_dwconv(x, weight, bias)

    out = jax.block_until_ready(dwconv_pallas(x, weight, bias))           # auto row tile
    assert out.shape == (N, C, H, W)
    assert jnp.allclose(out, ref, atol=1e-5, rtol=1e-5), "mismatch (auto tile)"

    out_t = jax.block_until_ready(dwconv_pallas(x, weight, bias, row_tile=4))  # 4 H-tiles
    assert jnp.allclose(out_t, ref, atol=1e-5, rtol=1e-5), "mismatch (row_tile=4)"

    # --- f32, channel-blocked path (C multiple of 128 -> Ct=128, nC=2) -------
    C2 = 256
    x2 = jax.random.normal(k_x2, (1, C2, 16, 16), dtype=jnp.float32)
    w2 = jax.random.uniform(k_w, (C2, 1, 3, 3), jnp.float32, -bound, bound)
    b2 = jax.random.uniform(k_b, (C2,), jnp.float32, -bound, bound)
    ref2 = _reference_dwconv(x2, w2, b2)
    out2 = jax.block_until_ready(dwconv_pallas(x2, w2, b2, row_tile=8))
    assert jnp.allclose(out2, ref2, atol=1e-5, rtol=1e-5), "mismatch (C=256)"

    # --- bf16 activations/params (v6e/v7x memory-bound path), f32 accumulation
    xb = x.astype(jnp.bfloat16)
    wb = weight.astype(jnp.bfloat16)
    bb = bias.astype(jnp.bfloat16)
    refb = _reference_dwconv(xb, wb, bb).astype(jnp.bfloat16)
    outb = jax.block_until_ready(dwconv_pallas(xb, wb, bb, row_tile=8))
    assert outb.dtype == jnp.bfloat16
    assert jnp.allclose(outb.astype(jnp.float32), refb.astype(jnp.float32),
                        atol=5e-2, rtol=5e-2), "mismatch (bf16)"

    print("KERNEL_OK")
</pallas_src>

<mosaic_0001>
module attributes {stable_mosaic.version = 11 : i64} {
  func.func @_dwconv_kernel(%arg0: i32, %arg1: i32, %arg2: i32, %arg3: memref<1x16x16x4xf32, #tpu.memory_space<vmem>>, %arg4: memref<1x1x16x4xf32, #tpu.memory_space<vmem>>, %arg5: memref<1x1x16x4xf32, #tpu.memory_space<vmem>>, %arg6: memref<3x3x4xf32, #tpu.memory_space<vmem>>, %arg7: memref<1x4xf32, #tpu.memory_space<vmem>>, %arg8: memref<1x16x16x4xf32, #tpu.memory_space<vmem>>) attributes {dimension_semantics = [#tpu.dimension_semantics<parallel>, #tpu.dimension_semantics<parallel>, #tpu.dimension_semantics<parallel>], iteration_bounds = array<i64: 2, 1, 1>, scalar_prefetch = 0 : i64, scratch_operands = 0 : i64, tpu.core_type = #tpu.core_type<tc>, window_params = [{transform_indices = @transform_0, window_bounds = array<i64: 1, 16, 16, 4>}, {transform_indices = @transform_1, window_bounds = array<i64: 1, 1, 16, 4>}, {transform_indices = @transform_2, window_bounds = array<i64: 1, 1, 16, 4>}, {transform_indices = @transform_3, window_bounds = array<i64: 3, 3, 4>}, {transform_indices = @transform_4, window_bounds = array<i64: 1, 4>}, {transform_indices = @transform_5, window_bounds = array<i64: 1, 16, 16, 4>}]} {
    %c0_i32 = arith.constant 0 : i32
    %0 = arith.cmpi sgt, %arg2, %c0_i32 : i32
    %1 = arith.extui %0 : i1 to i32
    %2 = arith.sitofp %1 : i32 to f32
    %c0_i32_0 = arith.constant 0 : i32
    %3 = arith.cmpi slt, %arg2, %c0_i32_0 : i32
    %4 = arith.extui %3 : i1 to i32
    %5 = arith.sitofp %4 : i32 to f32
    %c0 = arith.constant 0 : index
    %c0_1 = arith.constant 0 : index
    %c0_2 = arith.constant 0 : index
    %c0_3 = arith.constant 0 : index
    %6 = vector.load %arg4[%c0, %c0_1, %c0_2, %c0_3] : memref<1x1x16x4xf32, #tpu.memory_space<vmem>>, vector<1x1x16x4xf32>
    %7 = vector.shape_cast %6 : vector<1x1x16x4xf32> to vector<1x16x4xf32>
    %8 = vector.broadcast %2 : f32 to vector<1x16x4xf32>
    %9 = arith.mulf %7, %8 : vector<1x16x4xf32>
    %c0_4 = arith.constant 0 : index
    %c0_5 = arith.constant 0 : index
    %c0_6 = arith.constant 0 : index
    %c0_7 = arith.constant 0 : index
    %10 = vector.load %arg5[%c0_4, %c0_5, %c0_6, %c0_7] : memref<1x1x16x4xf32, #tpu.memory_space<vmem>>, vector<1x1x16x4xf32>
    %11 = vector.shape_cast %10 : vector<1x1x16x4xf32> to vector<1x16x4xf32>
    %12 = vector.broadcast %5 : f32 to vector<1x16x4xf32>
    %13 = arith.mulf %11, %12 : vector<1x16x4xf32>
    %c0_8 = arith.constant 0 : index
    %c0_9 = arith.constant 0 : index
    %c0_10 = arith.constant 0 : index
    %c0_11 = arith.constant 0 : index
    %14 = vector.load %arg3[%c0_8, %c0_9, %c0_10, %c0_11] : memref<1x16x16x4xf32, #tpu.memory_space<vmem>>, vector<1x16x16x4xf32>
    %15 = vector.shape_cast %14 : vector<1x16x16x4xf32> to vector<16x16x4xf32>
    %16 = tpu.concatenate %9, %15, %13 in 0 : vector<1x16x4xf32>, vector<16x16x4xf32>, vector<1x16x4xf32> -> vector<18x16x4xf32>
    %cst = arith.constant 0.000000e+00 : f32
    %17 = vector.broadcast %cst : f32 to vector<18x1x4xf32>
    %18 = vector.extract_strided_slice %16 {offsets = [0, 0, 0], sizes = [18, 15, 4], strides = [1, 1, 1]} : vector<18x16x4xf32> to vector<18x15x4xf32>
    %19 = tpu.concatenate %17, %18 in 1 : vector<18x1x4xf32>, vector<18x15x4xf32> -> vector<18x16x4xf32>
    %20 = vector.extract_strided_slice %16 {offsets = [0, 1, 0], sizes = [18, 15, 4], strides = [1, 1, 1]} : vector<18x16x4xf32> to vector<18x15x4xf32>
    %21 = tpu.concatenate %20, %17 in 1 : vector<18x15x4xf32>, vector<18x1x4xf32> -> vector<18x16x4xf32>
    %cst_12 = arith.constant 0.000000e+00 : f32
    %22 = vector.broadcast %cst_12 : f32 to vector<16x16x4xf32>
    %23 = vector.extract_strided_slice %19 {offsets = [0, 0, 0], sizes = [16, 16, 4], strides = [1, 1, 1]} : vector<18x16x4xf32> to vector<16x16x4xf32>
    %c0_13 = arith.constant 0 : index
    %c0_14 = arith.constant 0 : index
    %c0_15 = arith.constant 0 : index
    %24 = vector.load %arg6[%c0_13, %c0_14, %c0_15] : memref<3x3x4xf32, #tpu.memory_space<vmem>>, vector<1x1x4xf32>
    %25 = vector.shape_cast %24 : vector<1x1x4xf32> to vector<4xf32>
    %26 = vector.shape_cast %25 : vector<4xf32> to vector<1x1x4xf32>
    %27 = vector.broadcast %26 : vector<1x1x4xf32> to vector<16x16x4xf32>
    %28 = arith.mulf %23, %27 : vector<16x16x4xf32>
    %29 = arith.addf %22, %28 : vector<16x16x4xf32>
    %30 = vector.extract_strided_slice %19 {offsets = [1, 0, 0], sizes = [16, 16, 4], strides = [1, 1, 1]} : vector<18x16x4xf32> to vector<16x16x4xf32>
    %c1 = arith.constant 1 : index
    %c0_16 = arith.constant 0 : index
    %c0_17 = arith.constant 0 : index
    %31 = vector.load %arg6[%c1, %c0_16, %c0_17] : memref<3x3x4xf32, #tpu.memory_space<vmem>>, vector<1x1x4xf32>
    %32 = vector.shape_cast %31 : vector<1x1x4xf32> to vector<4xf32>
    %33 = vector.shape_cast %32 : vector<4xf32> to vector<1x1x4xf32>
    %34 = vector.broadcast %33 : vector<1x1x4xf32> to vector<16x16x4xf32>
    %35 = arith.mulf %30, %34 : vector<16x16x4xf32>
    %36 = arith.addf %29, %35 : vector<16x16x4xf32>
    %37 = vector.extract_strided_slice %19 {offsets = [2, 0, 0], sizes = [16, 16, 4], strides = [1, 1, 1]} : vector<18x16x4xf32> to vector<16x16x4xf32>
    %c2 = arith.constant 2 : index
    %c0_18 = arith.constant 0 : index
    %c0_19 = arith.constant 0 : index
    %38 = vector.load %arg6[%c2, %c0_18, %c0_19] : memref<3x3x4xf32, #tpu.memory_space<vmem>>, vector<1x1x4xf32>
    %39 = vector.shape_cast %38 : vector<1x1x4xf32> to vector<4xf32>
    %40 = vector.shape_cast %39 : vector<4xf32> to vector<1x1x4xf32>
    %41 = vector.broadcast %40 : vector<1x1x4xf32> to vector<16x16x4xf32>
    %42 = arith.mulf %37, %41 : vector<16x16x4xf32>
    %43 = arith.addf %36, %42 : vector<16x16x4xf32>
    %44 = vector.extract_strided_slice %16 {offsets = [0, 0, 0], sizes = [16, 16, 4], strides = [1, 1, 1]} : vector<18x16x4xf32> to vector<16x16x4xf32>
    %c0_20 = arith.constant 0 : index
    %c1_21 = arith.constant 1 : index
    %c0_22 = arith.constant 0 : index
    %45 = vector.load %arg6[%c0_20, %c1_21, %c0_22] : memref<3x3x4xf32, #tpu.memory_space<vmem>>, vector<1x1x4xf32>
    %46 = vector.shape_cast %45 : vector<1x1x4xf32> to vector<4xf32>
    %47 = vector.shape_cast %46 : vector<4xf32> to vector<1x1x4xf32>
    %48 = vector.broadcast %47 : vector<1x1x4xf32> to vector<16x16x4xf32>
    %49 = arith.mulf %44, %48 : vector<16x16x4xf32>
    %50 = arith.addf %43, %49 : vector<16x16x4xf32>
    %51 = vector.extract_strided_slice %16 {offsets = [1, 0, 0], sizes = [16, 16, 4], strides = [1, 1, 1]} : vector<18x16x4xf32> to vector<16x16x4xf32>
    %c1_23 = arith.constant 1 : index
    %c1_24 = arith.constant 1 : index
    %c0_25 = arith.constant 0 : index
    %52 = vector.load %arg6[%c1_23, %c1_24, %c0_25] : memref<3x3x4xf32, #tpu.memory_space<vmem>>, vector<1x1x4xf32>
    %53 = vector.shape_cast %52 : vector<1x1x4xf32> to vector<4xf32>
    %54 = vector.shape_cast %53 : vector<4xf32> to vector<1x1x4xf32>
    %55 = vector.broadcast %54 : vector<1x1x4xf32> to vector<16x16x4xf32>
    %56 = arith.mulf %51, %55 : vector<16x16x4xf32>
    %57 = arith.addf %50, %56 : vector<16x16x4xf32>
    %58 = vector.extract_strided_slice %16 {offsets = [2, 0, 0], sizes = [16, 16, 4], strides = [1, 1, 1]} : vector<18x16x4xf32> to vector<16x16x4xf32>
    %c2_26 = arith.constant 2 : index
    %c1_27 = arith.constant 1 : index
    %c0_28 = arith.constant 0 : index
    %59 = vector.load %arg6[%c2_26, %c1_27, %c0_28] : memref<3x3x4xf32, #tpu.memory_space<vmem>>, vector<1x1x4xf32>
    %60 = vector.shape_cast %59 : vector<1x1x4xf32> to vector<4xf32>
    %61 = vector.shape_cast %60 : vector<4xf32> to vector<1x1x4xf32>
    %62 = vector.broadcast %61 : vector<1x1x4xf32> to vector<16x16x4xf32>
    %63 = arith.mulf %58, %62 : vector<16x16x4xf32>
    %64 = arith.addf %57, %63 : vector<16x16x4xf32>
    %65 = vector.extract_strided_slice %21 {offsets = [0, 0, 0], sizes = [16, 16, 4], strides = [1, 1, 1]} : vector<18x16x4xf32> to vector<16x16x4xf32>
    %c0_29 = arith.constant 0 : index
    %c2_30 = arith.constant 2 : index
    %c0_31 = arith.constant 0 : index
    %66 = vector.load %arg6[%c0_29, %c2_30, %c0_31] : memref<3x3x4xf32, #tpu.memory_space<vmem>>, vector<1x1x4xf32>
    %67 = vector.shape_cast %66 : vector<1x1x4xf32> to vector<4xf32>
    %68 = vector.shape_cast %67 : vector<4xf32> to vector<1x1x4xf32>
    %69 = vector.broadcast %68 : vector<1x1x4xf32> to vector<16x16x4xf32>
    %70 = arith.mulf %65, %69 : vector<16x16x4xf32>
    %71 = arith.addf %64, %70 : vector<16x16x4xf32>
    %72 = vector.extract_strided_slice %21 {offsets = [1, 0, 0], sizes = [16, 16, 4], strides = [1, 1, 1]} : vector<18x16x4xf32> to vector<16x16x4xf32>
    %c1_32 = arith.constant 1 : index
    %c2_33 = arith.constant 2 : index
    %c0_34 = arith.constant 0 : index
    %73 = vector.load %arg6[%c1_32, %c2_33, %c0_34] : memref<3x3x4xf32, #tpu.memory_space<vmem>>, vector<1x1x4xf32>
    %74 = vector.shape_cast %73 : vector<1x1x4xf32> to vector<4xf32>
    %75 = vector.shape_cast %74 : vector<4xf32> to vector<1x1x4xf32>
    %76 = vector.broadcast %75 : vector<1x1x4xf32> to vector<16x16x4xf32>
    %77 = arith.mulf %72, %76 : vector<16x16x4xf32>
    %78 = arith.addf %71, %77 : vector<16x16x4xf32>
    %79 = vector.extract_strided_slice %21 {offsets = [2, 0, 0], sizes = [16, 16, 4], strides = [1, 1, 1]} : vector<18x16x4xf32> to vector<16x16x4xf32>
    %c2_35 = arith.constant 2 : index
    %c2_36 = arith.constant 2 : index
    %c0_37 = arith.constant 0 : index
    %80 = vector.load %arg6[%c2_35, %c2_36, %c0_37] : memref<3x3x4xf32, #tpu.memory_space<vmem>>, vector<1x1x4xf32>
    %81 = vector.shape_cast %80 : vector<1x1x4xf32> to vector<4xf32>
    %82 = vector.shape_cast %81 : vector<4xf32> to vector<1x1x4xf32>
    %83 = vector.broadcast %82 : vector<1x1x4xf32> to vector<16x16x4xf32>
    %84 = arith.mulf %79, %83 : vector<16x16x4xf32>
    %85 = arith.addf %78, %84 : vector<16x16x4xf32>
    %c0_38 = arith.constant 0 : index
    %c0_39 = arith.constant 0 : index
    %86 = vector.load %arg7[%c0_38, %c0_39] : memref<1x4xf32, #tpu.memory_space<vmem>>, vector<1x4xf32>
    %87 = vector.shape_cast %86 : vector<1x4xf32> to vector<4xf32>
    %88 = vector.shape_cast %87 : vector<4xf32> to vector<1x1x4xf32>
    %89 = vector.broadcast %88 : vector<1x1x4xf32> to vector<16x16x4xf32>
    %90 = arith.addf %85, %89 : vector<16x16x4xf32>
    %c0_40 = arith.constant 0 : index
    %c0_41 = arith.constant 0 : index
    %c0_42 = arith.constant 0 : index
    %c0_43 = arith.constant 0 : index
    %91 = vector.load %arg8[%c0_40, %c0_41, %c0_42, %c0_43] : memref<1x16x16x4xf32, #tpu.memory_space<vmem>>, vector<1x16x16x4xf32>
    %92 = vector.shape_cast %91 : vector<1x16x16x4xf32> to vector<16x16x4xf32>
    %93 = vector.shape_cast %90 : vector<16x16x4xf32> to vector<1x16x16x4xf32>
    tpu.vector_store %arg8[%c0_40, %c0_41, %c0_42, %c0_43], %93 {strides = array<i32>} : memref<1x16x16x4xf32, #tpu.memory_space<vmem>>, vector<1x16x16x4xf32>,
    return
  }
  func.func @transform_0(%arg0: i32, %arg1: i32, %arg2: i32) -> (i32, i32, i32, i32) {
    %c0_i32 = arith.constant 0 : i32
    %c0_i32_0 = arith.constant 0 : i32
    return %arg0, %arg2, %c0_i32, %arg1 : i32, i32, i32, i32
  }
  func.func @transform_1(%arg0: i32, %arg1: i32, %arg2: i32) -> (i32, i32, i32, i32) {
    %c16_i32 = arith.constant 16 : i32
    %0 = arith.muli %arg2, %c16_i32 : i32
    %c1_i32 = arith.constant 1 : i32
    %1 = arith.subi %0, %c1_i32 : i32
    %c0_i32 = arith.constant 0 : i32
    %2 = arith.maxsi %1, %c0_i32 : i32
    %c0_i32_0 = arith.constant 0 : i32
    %c0_i32_1 = arith.constant 0 : i32
    return %arg0, %2, %c0_i32_0, %arg1 : i32, i32, i32, i32
  }
  func.func @transform_2(%arg0: i32, %arg1: i32, %arg2: i32) -> (i32, i32, i32, i32) {
    %c16_i32 = arith.constant 16 : i32
    %0 = arith.muli %arg2, %c16_i32 : i32
    %c16_i32_0 = arith.constant 16 : i32
    %1 = arith.addi %0, %c16_i32_0 : i32
    %c15_i32 = arith.constant 15 : i32
    %2 = arith.minsi %1, %c15_i32 : i32
    %c0_i32 = arith.constant 0 : i32
    %c0_i32_1 = arith.constant 0 : i32
    return %arg0, %2, %c0_i32, %arg1 : i32, i32, i32, i32
  }
  func.func @transform_3(%arg0: i32, %arg1: i32, %arg2: i32) -> (i32, i32, i32) {
    %c0_i32 = arith.constant 0 : i32
    %c0_i32_0 = arith.constant 0 : i32
    %c0_i32_1 = arith.constant 0 : i32
    return %c0_i32, %c0_i32_0, %arg1 : i32, i32, i32
  }
  func.func @transform_4(%arg0: i32, %arg1: i32, %arg2: i32) -> (i32, i32) {
    %c0_i32 = arith.constant 0 : i32
    %c0_i32_0 = arith.constant 0 : i32
    return %c0_i32, %arg1 : i32, i32
  }
  func.func @transform_5(%arg0: i32, %arg1: i32, %arg2: i32) -> (i32, i32, i32, i32) {
    %c0_i32 = arith.constant 0 : i32
    %c0_i32_0 = arith.constant 0 : i32
    return %arg0, %arg2, %c0_i32, %arg1 : i32, i32, i32, i32
  }
}

</mosaic_0001>

<bundles_post_ra>
// kernel: tpu_custom_call.1
= control target key start
LH: loop header
LB: loop body
LE: loop exit
PB: predicated region body
PF: predicated region fallthrough
CT: control target
= control target key end

     0   :  { %s1783_s18 = smov 0   ;;  %s1785_s19 = smov 0   ;;  %s2928_s0 = inlined_call_operand.vmem [shape: f32[2,16,16,4], index: 0, kind: input, shape index: {}]   ;;  %s2929_s1 = inlined_call_operand.vmem [shape: f32[2,16,16,4], index: 1, kind: input, shape index: {}]   ;;  %s2930_s2 = inlined_call_operand.vmem [shape: f32[2,16,16,4], index: 2, kind: input, shape index: {}]   ;;  %s2931_s3 = inlined_call_operand.vmem [shape: f32[3,3,4], index: 3, kind: input, shape index: {}]   ;;  %s2932_s4 = inlined_call_operand.vmem [shape: f32[1,4], index: 4, kind: input, shape index: {}]   ;;  %s2933_s5 = inlined_call_operand.vmem [shape: f32[2,16,16,4], index: 5, kind: output, shape index: {}]  }
   0x1   :  { %s1787_s20 = smov 0  }
   0x2 LB: > { %s34_s21 = sadd.s32 1, %s1747_s19  ;;  %p1662_p0 = scmp.ge.s32.totalorder %s1751_s20, 1  ;;  %s1751_s20 = sphi %s1787_s20, %s15_s20   ;;  %s1747_s19 = sphi %s1785_s19, %s2935_s19   ;;  %s1743_s18 = sphi %s1783_s18, %s2934_s18  }
   0x3   : > { %p36_p1 = scmp.ge.s32.totalorder %s34_s21, 2  ;;  %p314_p2 = scmp.lt.s32.totalorder %s1751_s20, 3 }
   0x5   : > { %s2937_s21 = smov (%p36_p1, %s34_s21), 0  ;;  %p315_p3 = pnand %p1662_p0, %p314_p2 }
   0x6   : > { %p398_p4 = scmp.lt.s32.totalorder (!%p315_p3), %s1743_s18, 1  ;;  %vm556_vm0 = vcmask (!%p315_p3), 1040384   ;;  %v1819_v3 = vld [vmem:[%s2931_s3 + $0x4] ss:$0 sm:$0xff] (!%p315_p3)  ;;  %v1831_v9 = vld [vmem:[%s2931_s3] ss:$0 sm:$0xff] (!%p315_p3) }
   0x7   : > { %318 = sbr.rel (%p315_p3) target bundleno = 211 (0xd3), region = 40  ;;  %vm665_vm1 = vcmask (!%p315_p3), 1046528   ;;  %v1839_v13 = vld [vmem:[%s2931_s3 + $0x8] ss:$0 sm:$0xff] (!%p315_p3)  ;;  %v1845_v18 = vld [vmem:[%s2931_s3 + $0x1] ss:$0 sm:$0xff] (!%p315_p3) }
   0x8   : > { %v1857_v23 = vld [vmem:[%s2931_s3 + $0x5] ss:$0 sm:$0xff] (!%p315_p3)  ;;  %v1866_v28 = vld [vmem:[%s2931_s3 + $0x9] ss:$0 sm:$0xff] (!%p315_p3)  ;;  %v1875_v32 = vld [vmem:[%s2931_s3 + $0x2] ss:$0 sm:$0xff] (!%p315_p3) }
   0x9   : > { %v1880_v33 = vld [vmem:[%s2931_s3 + $0x6] ss:$0 sm:$0xff] (!%p315_p3)  ;;  %v1889_v37 = vld [vmem:[%s2931_s3 + $0xa] ss:$0 sm:$0xff] (!%p315_p3)  ;;  %vm1436_vm2 = vcmask (!%p315_p3), 31744  }
   0xe   : > { %s2939_s18 = smov (!%p398_p4, %s1743_s18), 1 }
   0xf   : > { %s1801_s22 = sshll.u32 %s2939_s18, 8 }
  0x10   : > { %s1807_s25 = scalar_lea.vmem %s2928_s0, %s1801_s22  ;;  %s426_s28 = scalar_lea.vmem %s2929_s1, %s1801_s22 }
  0x11   : > { %v478_v0 = vld [vmem:[%s426_s28] sm:$0xff]  ;;  %v479_v1 = vld [vmem:[%s426_s28 + $0x8] sm:$0xff]  ;;  %v1825_v7 = vld [vmem:[%s1807_s25 + $0x10] sm:$0xff]  ;;  %s1983_s6 = scalar_lea.vmem %s2933_s5, %s1801_s22 }
  0x12   : > { %v1814_v2 = vld [vmem:[%s1807_s25] sm:$0xff]  ;;  %v481_v4 = vmul.f32 0.0, %v478_v0  ;;  %v482_v5 = vmul.f32 0.0, %v479_v1  ;;  %v1822_v6 = vld [vmem:[%s1807_s25 + $0x8] sm:$0xff]  ;;  %v563_v10 = vrot.slane %v1825_v7, 7  ;;  %v1848_v19 = vld [vmem:[%s1807_s25 + $0x18] sm:$0xff]  ;;  %v1126_v40 = vmul.f32 %v1866_v28, %v1825_v7 }
  0x13   : > { %v560_v8 = vrot.slane %v1814_v2, 7  ;;  %v669_v11 = vrot.slane %v1814_v2, 1  ;;  %v670_v12 = vrot.slane %v1822_v6, 1  ;;  %v561_v20 = vrot.slane %v1822_v6, 7  ;;  %v1909_v51 = vld [vmem:[%s1807_s25 + $0x20] sm:$0xff]  ;;  %v1924_v60 = vld [vmem:[%s1807_s25 + $0x28] sm:$0xff] }
  0x14   : > { %v557_v14 = vrot.slane %v481_v4, 7  ;;  %v558_v15 = vrot.slane %v482_v5, 7  ;;  %v666_v17 = vrot.slane %v481_v4, 1  ;;  %v1852_v21 = vsel %vm556_vm0, 0.0, %v563_v10 }
  0x15   : > { %v648_v16 = vsel %vm556_vm0, 0.0, %v560_v8  ;;  %v667_v22 = vrot.slane %v482_v5, 1  ;;  %v672_v25 = vrot.slane %v1825_v7, 1  ;;  %v673_v26 = vrot.slane %v1848_v19, 1 }
  0x16   : > { %v647_v24 = vsel %vm556_vm0, 0.0, %v557_v14  ;;  %v849_v27 = vmul.f32 %v1819_v3, %v648_v16  ;;  %v919_v31 = vmul.f32 %v1839_v13, %v1852_v21  ;;  %v671_v34 = vsel %vm665_vm1, %v669_v11, %v670_v12 }
  0x17   : > { %v668_v29 = vsel %vm665_vm1, %v666_v17, %v667_v22  ;;  %v779_v30 = vmul.f32 %v1831_v9, %v647_v24  ;;  %v988_v35 = vmul.f32 %v1845_v18, %v481_v4  ;;  %v1057_v36 = vmul.f32 %v1857_v23, %v1814_v2 }
  0x18   : > { %v559_v38 = vsel %vm556_vm0, %v557_v14, %v558_v15  ;;  %v562_v41 = vsel %vm556_vm0, %v560_v8, %v561_v20  ;;  %v564_v42 = vrot.slane %v1848_v19, 7  ;;  %v1897_v43 = vsel %vm665_vm1, %v672_v25, %v673_v26 }
  0x19   : > { %v881_v39 = vadd.f32 %v849_v27, %v779_v30  ;;  %v1195_v44 = vmul.f32 %v1875_v32, %v668_v29  ;;  %v1264_v45 = vmul.f32 %v1880_v33, %v671_v34  ;;  %v780_v46 = vmul.f32 %v1831_v9, %v559_v38 }
  0x1a   : > { %v1333_v48 = vmul.f32 %v1889_v37, %v1897_v43  ;;  %v1905_v49 = vsel %vm556_vm0, %v563_v10, %v564_v42  ;;  %v850_v50 = vmul.f32 %v1819_v3, %v562_v41  ;;  %v756_v52 = vsel %vm665_vm1, %v667_v22, 0.0 }
  0x1b   : > { %v951_v47 = vadd.f32 %v919_v31, %v881_v39  ;;  %v1913_v53 = vsel %vm665_vm1, %v670_v12, 0.0  ;;  %v1916_v54 = vsel %vm665_vm1, %v673_v26, 0.0  ;;  %v920_v55 = vmul.f32 %v1839_v13, %v1905_v49 }
  0x1c   : > { %v882_v57 = vadd.f32 %v850_v50, %v780_v46  ;;  %v989_v58 = vmul.f32 %v1845_v18, %v482_v5  ;;  %v1058_v59 = vmul.f32 %v1857_v23, %v1822_v6  ;;  %v566_v61 = vrot.slane %v1909_v51, 7  ;;  %v1964_v46 = vld [vmem:[%s1807_s25 + $0x30] sm:$0xff] }
  0x1d   : > { %v1020_v56 = vadd.f32 %v988_v35, %v951_v47  ;;  %v675_v62 = vrot.slane %v1909_v51, 1  ;;  %v676_v63 = vrot.slane %v1924_v60, 1  ;;  %v781_v0 = vmul.f32 %v1831_v9, %v648_v16 }
  0x1e   : > { %v952_v4 = vadd.f32 %v920_v55, %v882_v57  ;;  %v1127_v8 = vmul.f32 %v1866_v28, %v1848_v19  ;;  %v851_v5 = vmul.f32 %v1819_v3, %v1852_v21  ;;  %v1196_v10 = vmul.f32 %v1875_v32, %v756_v52 }
  0x1f   : > { %v1089_v1 = vadd.f32 %v1057_v36, %v1020_v56  ;;  %v1265_v11 = vmul.f32 %v1880_v33, %v1913_v53  ;;  %v1938_v12 = vsel %vm556_vm0, 0.0, %v566_v61  ;;  %v990_v14 = vmul.f32 %v1845_v18, %v1814_v2 }
  0x20   : > { %v1021_v16 = vadd.f32 %v989_v58, %v952_v4  ;;  %v883_v17 = vadd.f32 %v851_v5, %v781_v0  ;;  %v921_v20 = vmul.f32 %v1839_v13, %v1938_v12  ;;  %v1334_v22 = vmul.f32 %v1889_v37, %v1916_v54 }
  0x21   : > { %v1158_v15 = vadd.f32 %v1126_v40, %v1089_v1  ;;  %v1947_v24 = vsel %vm665_vm1, %v675_v62, %v676_v63  ;;  %v1059_v25 = vmul.f32 %v1857_v23, %v1825_v7  ;;  %v567_v26 = vrot.slane %v1924_v60, 7 }
  0x22   : > { %v1090_v2 = vadd.f32 %v1058_v59, %v1021_v16  ;;  %v953_v29 = vadd.f32 %v921_v20, %v883_v17  ;;  %v1128_v30 = vmul.f32 %v1866_v28, %v1909_v51  ;;  %v1197_v31 = vmul.f32 %v1875_v32, %v671_v34  ;;  %v1969_v34 = vld [vmem:[%s2932_s4] ss:$0 sm:$0xff] }
  0x23   : > { %v1227_v27 = vadd.f32 %v1195_v44, %v1158_v15  ;;  %v1956_v35 = vsel %vm556_vm0, %v566_v61, %v567_v26  ;;  %v782_v36 = vmul.f32 %v1831_v9, %v562_v41  ;;  %v852_v38 = vmul.f32 %v1819_v3, %v1905_v49  ;;  %v1988_v61 = vld [vmem:[%s1807_s25 + $0x38] sm:$0xff] }
  0x24   : > { %v1159_v40 = vadd.f32 %v1127_v8, %v1090_v2  ;;  %v1022_v42 = vadd.f32 %v990_v14, %v953_v29  ;;  %v922_v44 = vmul.f32 %v1839_v13, %v1956_v35  ;;  %v1266_v41 = vmul.f32 %v1880_v33, %v1897_v43 }
  0x25   : > { %v1296_v39 = vadd.f32 %v1264_v45, %v1227_v27  ;;  %v1335_v47 = vmul.f32 %v1889_v37, %v1947_v24  ;;  %v884_v45 = vadd.f32 %v852_v38, %v782_v36  ;;  %v991_v50 = vmul.f32 %v1845_v18, %v1822_v6 }
  0x26   : > { %v1228_v55 = vadd.f32 %v1196_v10, %v1159_v40  ;;  %v1091_v56 = vadd.f32 %v1059_v25, %v1022_v42  ;;  %v1060_v57 = vmul.f32 %v1857_v23, %v1848_v19  ;;  %v1129_v59 = vmul.f32 %v1866_v28, %v1924_v60 }
  0x27   : > { %v1365_v52 = vadd.f32 %v1333_v48, %v1296_v39  ;;  %v954_v58 = vadd.f32 %v922_v44, %v884_v45  ;;  %v569_v6 = vrot.slane %v1964_v46, 7  ;;  %v678_v48 = vrot.slane %v1964_v46, 1  ;;  %v2034_v45 = vld [vmem:[%s1807_s25 + $0x40] sm:$0xff] }
  0x28   : > { %v1297_v0 = vadd.f32 %v1265_v11, %v1228_v55  ;;  %v1160_v1 = vadd.f32 %v1128_v30, %v1091_v56  ;;  %v679_v4 = vrot.slane %v1988_v61, 1  ;;  %v783_v10 = vmul.f32 %v1831_v9, %v1852_v21 }
  0x29   : > { %v1404_v62 = vadd.f32 %v1969_v34, %v1365_v52  ;;  %v1023_v8 = vadd.f32 %v991_v50, %v954_v58  ;;  %v1995_v5 = vsel %vm556_vm0, 0.0, %v569_v6  ;;  %v853_v14 = vmul.f32 %v1819_v3, %v1938_v12 }
  0x2a   : > { %v1366_v15 = vadd.f32 %v1334_v22, %v1297_v0  ;;  %v1229_v16 = vadd.f32 %v1197_v31, %v1160_v1  ;;  %v2004_v11 = vsel %vm665_vm1, %v676_v63, 0.0  ;;  %v923_v17 = vmul.f32 %v1839_v13, %v1995_v5  ;;  %v2056_v1 = vld [vmem:[%s1807_s25 + $0x48] sm:$0xff] }
  0x2b   : > { %1437 = vst.msk [vmem:[%s1983_s6] sm:$0xff] %vm1436_vm2, %v1404_v62  ;;  %v1092_v20 = vadd.f32 %v1060_v57, %v1023_v8  ;;  %v1198_v25 = vmul.f32 %v1875_v32, %v1913_v53  ;;  %v885_v26 = vadd.f32 %v853_v14, %v783_v10  ;;  %v992_v21 = vmul.f32 %v1845_v18, %v1825_v7 }
  0x2c   : > { %v1405_v27 = vadd.f32 %v1969_v34, %v1366_v15  ;;  %v1298_v2 = vadd.f32 %v1266_v41, %v1229_v16  ;;  %v1267_v22 = vmul.f32 %v1880_v33, %v1916_v54  ;;  %v1336_v63 = vmul.f32 %v1889_v37, %v2004_v11 }
  0x2d   : > { %v1161_v29 = vadd.f32 %v1129_v59, %v1092_v20  ;;  %v2018_v30 = vsel %vm665_vm1, %v678_v48, %v679_v4  ;;  %v955_v31 = vadd.f32 %v923_v17, %v885_v26  ;;  %v1061_v53 = vmul.f32 %v1857_v23, %v1909_v51 }
  0x2e   : > { %1438 = vst.msk [vmem:[%s1983_s6 + $0x8] sm:$0xff] %vm1436_vm2, %v1405_v27  ;;  %v1367_v7 = vadd.f32 %v1335_v47, %v1298_v2  ;;  %v1130_v36 = vmul.f32 %v1866_v28, %v1964_v46  ;;  %v570_v38 = vrot.slane %v1988_v61, 7  ;;  %v784_v39 = vmul.f32 %v1831_v9, %v1905_v49 }
  0x2f   : > { %v1230_v40 = vadd.f32 %v1198_v25, %v1161_v29  ;;  %v1024_v42 = vadd.f32 %v992_v21, %v955_v31  ;;  %v1199_v44 = vmul.f32 %v1875_v32, %v1897_v43  ;;  %v854_v41 = vmul.f32 %v1819_v3, %v1956_v35 }
  0x30   : > { %v1406_v47 = vadd.f32 %v1969_v34, %v1367_v7  ;;  %v1268_v50 = vmul.f32 %v1880_v33, %v1947_v24  ;;  %v2040_v52 = vsel %vm556_vm0, %v569_v6, %v570_v38  ;;  %v993_v49 = vmul.f32 %v1845_v18, %v1848_v19 }
  0x31   : > { %v1299_v55 = vadd.f32 %v1267_v22, %v1230_v40  ;;  %v1093_v56 = vadd.f32 %v1061_v53, %v1024_v42  ;;  %v886_v43 = vadd.f32 %v854_v41, %v784_v39  ;;  %v924_v57 = vmul.f32 %v1839_v13, %v2040_v52  ;;  %v2099_v41 = vld [vmem:[%s1807_s25 + $0x50] sm:$0xff] }
  0x32   : > { %1439 = vst.msk [vmem:[%s1983_s6 + $0x10] sm:$0xff] %vm1436_vm2, %v1406_v47  ;;  %v1337_v58 = vmul.f32 %v1889_v37, %v2018_v30  ;;  %v1062_v59 = vmul.f32 %v1857_v23, %v1924_v60  ;;  %v1131_v6 = vmul.f32 %v1866_v28, %v1988_v61  ;;  %v572_v48 = vrot.slane %v2034_v45, 7 }
  0x33   : > { %v1368_v19 = vadd.f32 %v1336_v63, %v1299_v55  ;;  %v1162_v62 = vadd.f32 %v1130_v36, %v1093_v56  ;;  %v956_v0 = vadd.f32 %v924_v57, %v886_v43  ;;  %v681_v8 = vrot.slane %v2034_v45, 1 }
  0x34   : > { %v2060_v10 = vsel %vm556_vm0, 0.0, %v572_v48  ;;  %v682_v14 = vrot.slane %v2056_v1, 1  ;;  %v785_v15 = vmul.f32 %v1831_v9, %v1938_v12  ;;  %v855_v16 = vmul.f32 %v1819_v3, %v1995_v5 }
  0x35   : > { %v1407_v17 = vadd.f32 %v1969_v34, %v1368_v19  ;;  %v1231_v20 = vadd.f32 %v1199_v44, %v1162_v62  ;;  %v1025_v25 = vadd.f32 %v993_v49, %v956_v0  ;;  %v925_v26 = vmul.f32 %v1839_v13, %v2060_v10 }
  0x36   : > { %v2071_v21 = vsel %vm665_vm1, %v679_v4, 0.0  ;;  %v887_v27 = vadd.f32 %v855_v16, %v785_v15  ;;  %v994_v2 = vmul.f32 %v1845_v18, %v1909_v51  ;;  %v1200_v63 = vmul.f32 %v1875_v32, %v1916_v54 }
  0x37   : > { %1440 = vst.msk [vmem:[%s1983_s6 + $0x18] sm:$0xff] %vm1436_vm2, %v1407_v17  ;;  %v1300_v12 = vadd.f32 %v1268_v50, %v1231_v20  ;;  %v1094_v22 = vadd.f32 %v1062_v59, %v1025_v25  ;;  %v1269_v29 = vmul.f32 %v1880_v33, %v2004_v11  ;;  %v1338_v31 = vmul.f32 %v1889_v37, %v2071_v21 }
  0x38   : > { %v957_v4 = vadd.f32 %v925_v26, %v887_v27  ;;  %v1063_v53 = vmul.f32 %v1857_v23, %v1964_v46  ;;  %v573_v51 = vrot.slane %v2056_v1, 7  ;;  %v2087_v38 = vsel %vm665_vm1, %v681_v8, %v682_v14 }
  0x39   : > { %v1369_v7 = vadd.f32 %v1337_v58, %v1300_v12  ;;  %v1163_v36 = vadd.f32 %v1131_v6, %v1094_v22  ;;  %v786_v54 = vmul.f32 %v1831_v9, %v1956_v35  ;;  %v1132_v40 = vmul.f32 %v1866_v28, %v2034_v45 }
  0x3a   : > { %v1026_v39 = vadd.f32 %v994_v2, %v957_v4  ;;  %v2094_v42 = vsel %vm556_vm0, %v572_v48, %v573_v51  ;;  %v856_v44 = vmul.f32 %v1819_v3, %v2040_v52  ;;  %v1201_v49 = vmul.f32 %v1875_v32, %v1947_v24 }
  0x3b   : > { %v1408_v47 = vadd.f32 %v1969_v34, %v1369_v7  ;;  %v1232_v50 = vadd.f32 %v1200_v63, %v1163_v36  ;;  %v926_v35 = vmul.f32 %v1839_v13, %v2094_v42  ;;  %v1270_v56 = vmul.f32 %v1880_v33, %v2018_v30 }
  0x3c   : > { %v1095_v55 = vadd.f32 %v1063_v53, %v1026_v39  ;;  %v888_v43 = vadd.f32 %v856_v44, %v786_v54  ;;  %v995_v57 = vmul.f32 %v1845_v18, %v1924_v60  ;;  %v1339_v59 = vmul.f32 %v1889_v37, %v2087_v38  ;;  %v2121_v60 = vld [vmem:[%s1807_s25 + $0x58] sm:$0xff] }
  0x3d   : > { %1441 = vst.msk [vmem:[%s1983_s6 + $0x20] sm:$0xff] %vm1436_vm2, %v1408_v47  ;;  %v1301_v58 = vadd.f32 %v1269_v29, %v1232_v50  ;;  %v1064_v24 = vmul.f32 %v1857_v23, %v1988_v61  ;;  %v575_v6 = vrot.slane %v2099_v41, 7  ;;  %v1133_v62 = vmul.f32 %v1866_v28, %v2056_v1  ;;  %v2163_v50 = vld [vmem:[%s1807_s25 + $0x60] sm:$0xff] }
  0x3e   : > { %v1164_v48 = vadd.f32 %v1132_v40, %v1095_v55  ;;  %v958_v19 = vadd.f32 %v926_v35, %v888_v43  ;;  %v684_v0 = vrot.slane %v2099_v41, 1  ;;  %v787_v16 = vmul.f32 %v1831_v9, %v1995_v5 }
  0x3f   : > { %v1370_v8 = vadd.f32 %v1338_v31, %v1301_v58  ;;  %v2124_v15 = vsel %vm556_vm0, 0.0, %v575_v6  ;;  %v857_v17 = vmul.f32 %v1819_v3, %v2060_v10  ;;  %v685_v26 = vrot.slane %v2121_v60, 1 }
  0x40   : > { %v1233_v20 = vadd.f32 %v1201_v49, %v1164_v48  ;;  %v1027_v25 = vadd.f32 %v995_v57, %v958_v19  ;;  %v927_v27 = vmul.f32 %v1839_v13, %v2124_v15  ;;  %v2135_v12 = vsel %vm665_vm1, %v682_v14, 0.0 }
  0x41   : > { %v1409_v2 = vadd.f32 %v1969_v34, %v1370_v8  ;;  %v889_v22 = vadd.f32 %v857_v17, %v787_v16  ;;  %v996_v63 = vmul.f32 %v1845_v18, %v1964_v46  ;;  %v1202_v31 = vmul.f32 %v1875_v32, %v2004_v11 }
  0x42   : > { %v1302_v5 = vadd.f32 %v1270_v56, %v1233_v20  ;;  %v1096_v29 = vadd.f32 %v1064_v24, %v1027_v25  ;;  %v1271_v4 = vmul.f32 %v1880_v33, %v2071_v21  ;;  %v1340_v53 = vmul.f32 %v1889_v37, %v2135_v12 }
  0x43   : > { %1442 = vst.msk [vmem:[%s1983_s6 + $0x28] sm:$0xff] %vm1436_vm2, %v1409_v2  ;;  %v959_v14 = vadd.f32 %v927_v27, %v889_v22  ;;  %v1065_v51 = vmul.f32 %v1857_v23, %v2034_v45  ;;  %v576_v46 = vrot.slane %v2121_v60, 7  ;;  %v2151_v54 = vsel %vm665_vm1, %v684_v0, %v685_v26 }
  0x44   : > { %v1371_v7 = vadd.f32 %v1339_v59, %v1302_v5  ;;  %v1165_v36 = vadd.f32 %v1133_v62, %v1096_v29  ;;  %v788_v11 = vmul.f32 %v1831_v9, %v2040_v52  ;;  %v1134_v40 = vmul.f32 %v1866_v28, %v2099_v41 }
  0x45   : > { %v1028_v39 = vadd.f32 %v996_v63, %v959_v14  ;;  %v2158_v44 = vsel %vm556_vm0, %v575_v6, %v576_v46  ;;  %v858_v47 = vmul.f32 %v1819_v3, %v2094_v42  ;;  %v1203_v55 = vmul.f32 %v1875_v32, %v2018_v30 }
  0x46   : > { %v1410_v49 = vadd.f32 %v1969_v34, %v1371_v7  ;;  %v1234_v35 = vadd.f32 %v1202_v31, %v1165_v36  ;;  %v928_v52 = vmul.f32 %v1839_v13, %v2158_v44  ;;  %v1272_v43 = vmul.f32 %v1880_v33, %v2087_v38 }
  0x47   : > { %v1097_v56 = vadd.f32 %v1065_v51, %v1028_v39  ;;  %v890_v57 = vadd.f32 %v858_v47, %v788_v11  ;;  %v997_v58 = vmul.f32 %v1845_v18, %v1988_v61  ;;  %v1341_v24 = vmul.f32 %v1889_v37, %v2151_v54  ;;  %v2185_v61 = vld [vmem:[%s1807_s25 + $0x68] sm:$0xff] }
  0x48   : > { %1443 = vst.msk [vmem:[%s1983_s6 + $0x30] sm:$0xff] %vm1436_vm2, %v1410_v49  ;;  %v1303_v59 = vadd.f32 %v1271_v4, %v1234_v35  ;;  %v1066_v30 = vmul.f32 %v1857_v23, %v2056_v1  ;;  %v578_v6 = vrot.slane %v2163_v50, 7  ;;  %v1135_v62 = vmul.f32 %v1866_v28, %v2121_v60  ;;  %v2227_v35 = vld [vmem:[%s1807_s25 + $0x70] sm:$0xff] }
  0x49   : > { %v1166_v48 = vadd.f32 %v1134_v40, %v1097_v56  ;;  %v960_v19 = vadd.f32 %v928_v52, %v890_v57  ;;  %v687_v0 = vrot.slane %v2163_v50, 1  ;;  %v789_v17 = vmul.f32 %v1831_v9, %v2060_v10 }
  0x4a   : > { %v1372_v8 = vadd.f32 %v1340_v53, %v1303_v59  ;;  %v2188_v16 = vsel %vm556_vm0, 0.0, %v578_v6  ;;  %v859_v20 = vmul.f32 %v1819_v3, %v2124_v15  ;;  %v688_v2 = vrot.slane %v2185_v61, 1 }
  0x4b   : > { %v1235_v25 = vadd.f32 %v1203_v55, %v1166_v48  ;;  %v1029_v27 = vadd.f32 %v997_v58, %v960_v19  ;;  %v929_v22 = vmul.f32 %v1839_v13, %v2188_v16  ;;  %v2199_v5 = vsel %vm665_vm1, %v685_v26, 0.0 }
  0x4c   : > { %v1411_v63 = vadd.f32 %v1969_v34, %v1372_v8  ;;  %v891_v29 = vadd.f32 %v859_v20, %v789_v17  ;;  %v998_v31 = vmul.f32 %v1845_v18, %v2034_v45  ;;  %v1204_v53 = vmul.f32 %v1875_v32, %v2071_v21 }
  0x4d   : > { %v1304_v10 = vadd.f32 %v1272_v43, %v1235_v25  ;;  %v1098_v4 = vadd.f32 %v1066_v30, %v1029_v27  ;;  %v1273_v14 = vmul.f32 %v1880_v33, %v2135_v12  ;;  %v1342_v51 = vmul.f32 %v1889_v37, %v2199_v5 }
  0x4e   : > { %1444 = vst.msk [vmem:[%s1983_s6 + $0x38] sm:$0xff] %vm1436_vm2, %v1411_v63  ;;  %v961_v26 = vadd.f32 %v929_v22, %v891_v29  ;;  %v1067_v46 = vmul.f32 %v1857_v23, %v2099_v41  ;;  %v579_v45 = vrot.slane %v2185_v61, 7  ;;  %v2215_v11 = vsel %vm665_vm1, %v687_v0, %v688_v2 }
  0x4f   : > { %v1373_v7 = vadd.f32 %v1341_v24, %v1304_v10  ;;  %v1167_v36 = vadd.f32 %v1135_v62, %v1098_v4  ;;  %v790_v21 = vmul.f32 %v1831_v9, %v2094_v42  ;;  %v1136_v40 = vmul.f32 %v1866_v28, %v2163_v50 }
  0x50   : > { %v1030_v39 = vadd.f32 %v998_v31, %v961_v26  ;;  %v2222_v47 = vsel %vm556_vm0, %v578_v6, %v579_v45  ;;  %v860_v49 = vmul.f32 %v1819_v3, %v2158_v44  ;;  %v1205_v56 = vmul.f32 %v1875_v32, %v2087_v38 }
  0x51   : > { %v1412_v55 = vadd.f32 %v1969_v34, %v1373_v7  ;;  %v1236_v52 = vadd.f32 %v1204_v53, %v1167_v36  ;;  %v930_v42 = vmul.f32 %v1839_v13, %v2222_v47  ;;  %v1274_v57 = vmul.f32 %v1880_v33, %v2151_v54 }
  0x52   : > { %v1099_v43 = vadd.f32 %v1067_v46, %v1030_v39  ;;  %v892_v58 = vadd.f32 %v860_v49, %v790_v21  ;;  %v999_v59 = vmul.f32 %v1845_v18, %v2056_v1  ;;  %v1343_v30 = vmul.f32 %v1889_v37, %v2215_v11  ;;  %v2249_v1 = vld [vmem:[%s1807_s25 + $0x78] sm:$0xff] }
  0x53   : > { %1445 = vst.msk [vmem:[%s1983_s6 + $0x40] sm:$0xff] %vm1436_vm2, %v1412_v55  ;;  %v1305_v24 = vadd.f32 %v1273_v14, %v1236_v52  ;;  %v1068_v38 = vmul.f32 %v1857_v23, %v2121_v60  ;;  %v581_v6 = vrot.slane %v2227_v35, 7  ;;  %v1137_v62 = vmul.f32 %v1866_v28, %v2185_v61  ;;  %v2291_v52 = vld [vmem:[%s1807_s25 + $0x80] sm:$0xff] }
  0x54   : > { %v1168_v48 = vadd.f32 %v1136_v40, %v1099_v43  ;;  %v962_v19 = vadd.f32 %v930_v42, %v892_v58  ;;  %v690_v0 = vrot.slane %v2227_v35, 1  ;;  %v791_v20 = vmul.f32 %v1831_v9, %v2124_v15 }
  0x55   : > { %v1374_v8 = vadd.f32 %v1342_v51, %v1305_v24  ;;  %v2252_v17 = vsel %vm556_vm0, 0.0, %v581_v6  ;;  %v861_v25 = vmul.f32 %v1819_v3, %v2188_v16  ;;  %v691_v63 = vrot.slane %v2249_v1, 1 }
  0x56   : > { %v1237_v27 = vadd.f32 %v1205_v56, %v1168_v48  ;;  %v1031_v22 = vadd.f32 %v999_v59, %v962_v19  ;;  %v931_v29 = vmul.f32 %v1839_v13, %v2252_v17  ;;  %v2263_v10 = vsel %vm665_vm1, %v688_v2, 0.0 }
  0x57   : > { %v1413_v31 = vadd.f32 %v1969_v34, %v1374_v8  ;;  %v893_v4 = vadd.f32 %v861_v25, %v791_v20  ;;  %v1000_v53 = vmul.f32 %v1845_v18, %v2099_v41  ;;  %v1206_v51 = vmul.f32 %v1875_v32, %v2135_v12 }
  0x58   : > { %v1306_v15 = vadd.f32 %v1274_v57, %v1237_v27  ;;  %v1100_v14 = vadd.f32 %v1068_v38, %v1031_v22  ;;  %v1275_v26 = vmul.f32 %v1880_v33, %v2199_v5  ;;  %v1344_v46 = vmul.f32 %v1889_v37, %v2263_v10 }
  0x59   : > { %1446 = vst.msk [vmem:[%s1983_s6 + $0x48] sm:$0xff] %vm1436_vm2, %v1413_v31  ;;  %v963_v2 = vadd.f32 %v931_v29, %v893_v4  ;;  %v1069_v45 = vmul.f32 %v1857_v23, %v2163_v50  ;;  %v582_v41 = vrot.slane %v2249_v1, 7  ;;  %v2279_v21 = vsel %vm665_vm1, %v690_v0, %v691_v63 }
  0x5a   : > { %v1375_v7 = vadd.f32 %v1343_v30, %v1306_v15  ;;  %v1169_v36 = vadd.f32 %v1137_v62, %v1100_v14  ;;  %v792_v12 = vmul.f32 %v1831_v9, %v2158_v44  ;;  %v1138_v40 = vmul.f32 %v1866_v28, %v2227_v35 }
  0x5b   : > { %v1032_v39 = vadd.f32 %v1000_v53, %v963_v2  ;;  %v2286_v49 = vsel %vm556_vm0, %v581_v6, %v582_v41  ;;  %v862_v55 = vmul.f32 %v1819_v3, %v2222_v47  ;;  %v1207_v43 = vmul.f32 %v1875_v32, %v2151_v54 }
  0x5c   : > { %v1414_v56 = vadd.f32 %v1969_v34, %v1375_v7  ;;  %v1238_v42 = vadd.f32 %v1206_v51, %v1169_v36  ;;  %v932_v44 = vmul.f32 %v1839_v13, %v2286_v49  ;;  %v1276_v58 = vmul.f32 %v1880_v33, %v2215_v11 }
  0x5d   : > { %v1101_v57 = vadd.f32 %v1069_v45, %v1032_v39  ;;  %v894_v59 = vadd.f32 %v862_v55, %v792_v12  ;;  %v1001_v24 = vmul.f32 %v1845_v18, %v2121_v60  ;;  %v1345_v38 = vmul.f32 %v1889_v37, %v2279_v21  ;;  %v2313_v60 = vld [vmem:[%s1807_s25 + $0x88] sm:$0xff] }
  0x5e   : > { %1447 = vst.msk [vmem:[%s1983_s6 + $0x50] sm:$0xff] %vm1436_vm2, %v1414_v56  ;;  %v1307_v30 = vadd.f32 %v1275_v26, %v1238_v42  ;;  %v1070_v54 = vmul.f32 %v1857_v23, %v2185_v61  ;;  %v584_v6 = vrot.slane %v2291_v52, 7  ;;  %v1139_v62 = vmul.f32 %v1866_v28, %v2249_v1  ;;  %v2355_v42 = vld [vmem:[%s1807_s25 + $0x90] sm:$0xff] }
  0x5f   : > { %v1170_v48 = vadd.f32 %v1138_v40, %v1101_v57  ;;  %v964_v19 = vadd.f32 %v932_v44, %v894_v59  ;;  %v693_v0 = vrot.slane %v2291_v52, 1  ;;  %v793_v25 = vmul.f32 %v1831_v9, %v2188_v16 }
  0x60   : > { %v1376_v8 = vadd.f32 %v1344_v46, %v1307_v30  ;;  %v2316_v20 = vsel %vm556_vm0, 0.0, %v584_v6  ;;  %v863_v27 = vmul.f32 %v1819_v3, %v2252_v17  ;;  %v694_v31 = vrot.slane %v2313_v60, 1 }
  0x61   : > { %v1239_v22 = vadd.f32 %v1207_v43, %v1170_v48  ;;  %v1033_v29 = vadd.f32 %v1001_v24, %v964_v19  ;;  %v933_v4 = vmul.f32 %v1839_v13, %v2316_v20  ;;  %v2327_v15 = vsel %vm665_vm1, %v691_v63, 0.0 }
  0x62   : > { %v1415_v53 = vadd.f32 %v1969_v34, %v1376_v8  ;;  %v895_v14 = vadd.f32 %v863_v27, %v793_v25  ;;  %v1002_v51 = vmul.f32 %v1845_v18, %v2163_v50  ;;  %v1208_v46 = vmul.f32 %v1875_v32, %v2199_v5 }
  0x63   : > { %v1308_v16 = vadd.f32 %v1276_v58, %v1239_v22  ;;  %v1102_v26 = vadd.f32 %v1070_v54, %v1033_v29  ;;  %v1277_v2 = vmul.f32 %v1880_v33, %v2263_v10  ;;  %v1346_v45 = vmul.f32 %v1889_v37, %v2327_v15 }
  0x64   : > { %1448 = vst.msk [vmem:[%s1983_s6 + $0x58] sm:$0xff] %vm1436_vm2, %v1415_v53  ;;  %v965_v63 = vadd.f32 %v933_v4, %v895_v14  ;;  %v1071_v41 = vmul.f32 %v1857_v23, %v2227_v35  ;;  %v585_v50 = vrot.slane %v2313_v60, 7  ;;  %v2343_v12 = vsel %vm665_vm1, %v693_v0, %v694_v31 }
  0x65   : > { %v1377_v7 = vadd.f32 %v1345_v38, %v1308_v16  ;;  %v1171_v36 = vadd.f32 %v1139_v62, %v1102_v26  ;;  %v794_v5 = vmul.f32 %v1831_v9, %v2222_v47  ;;  %v1140_v40 = vmul.f32 %v1866_v28, %v2291_v52 }
  0x66   : > { %v1034_v39 = vadd.f32 %v1002_v51, %v965_v63  ;;  %v2350_v55 = vsel %vm556_vm0, %v584_v6, %v585_v50  ;;  %v864_v56 = vmul.f32 %v1819_v3, %v2286_v49  ;;  %v1209_v57 = vmul.f32 %v1875_v32, %v2215_v11 }
  0x67   : > { %v1416_v43 = vadd.f32 %v1969_v34, %v1377_v7  ;;  %v1240_v44 = vadd.f32 %v1208_v46, %v1171_v36  ;;  %v934_v47 = vmul.f32 %v1839_v13, %v2350_v55  ;;  %v1278_v59 = vmul.f32 %v1880_v33, %v2279_v21 }
  0x68   : > { %v1103_v58 = vadd.f32 %v1071_v41, %v1034_v39  ;;  %v896_v24 = vadd.f32 %v864_v56, %v794_v5  ;;  %v1003_v30 = vmul.f32 %v1845_v18, %v2185_v61  ;;  %v1347_v54 = vmul.f32 %v1889_v37, %v2343_v12  ;;  %v2377_v61 = vld [vmem:[%s1807_s25 + $0x98] sm:$0xff] }
  0x69   : > { %1449 = vst.msk [vmem:[%s1983_s6 + $0x60] sm:$0xff] %vm1436_vm2, %v1416_v43  ;;  %v1309_v38 = vadd.f32 %v1277_v2, %v1240_v44  ;;  %v1072_v11 = vmul.f32 %v1857_v23, %v2249_v1  ;;  %v587_v6 = vrot.slane %v2355_v42, 7  ;;  %v1141_v62 = vmul.f32 %v1866_v28, %v2313_v60  ;;  %v2419_v44 = vld [vmem:[%s1807_s25 + $0xa0] sm:$0xff] }
  0x6a   : > { %v1172_v48 = vadd.f32 %v1140_v40, %v1103_v58  ;;  %v966_v19 = vadd.f32 %v934_v47, %v896_v24  ;;  %v696_v0 = vrot.slane %v2355_v42, 1  ;;  %v795_v27 = vmul.f32 %v1831_v9, %v2252_v17 }
  0x6b   : > { %v1378_v8 = vadd.f32 %v1346_v45, %v1309_v38  ;;  %v2380_v25 = vsel %vm556_vm0, 0.0, %v587_v6  ;;  %v865_v22 = vmul.f32 %v1819_v3, %v2316_v20  ;;  %v697_v53 = vrot.slane %v2377_v61, 1 }
  0x6c   : > { %v1241_v29 = vadd.f32 %v1209_v57, %v1172_v48  ;;  %v1035_v4 = vadd.f32 %v1003_v30, %v966_v19  ;;  %v935_v14 = vmul.f32 %v1839_v13, %v2380_v25  ;;  %v2391_v16 = vsel %vm665_vm1, %v694_v31, 0.0 }
  0x6d   : > { %v1417_v51 = vadd.f32 %v1969_v34, %v1378_v8  ;;  %v897_v26 = vadd.f32 %v865_v22, %v795_v27  ;;  %v1004_v46 = vmul.f32 %v1845_v18, %v2227_v35  ;;  %v1210_v45 = vmul.f32 %v1875_v32, %v2263_v10 }
  0x6e   : > { %v1310_v17 = vadd.f32 %v1278_v59, %v1241_v29  ;;  %v1104_v2 = vadd.f32 %v1072_v11, %v1035_v4  ;;  %v1279_v63 = vmul.f32 %v1880_v33, %v2327_v15  ;;  %v1348_v41 = vmul.f32 %v1889_v37, %v2391_v16 }
  0x6f   : > { %1450 = vst.msk [vmem:[%s1983_s6 + $0x68] sm:$0xff] %vm1436_vm2, %v1417_v51  ;;  %v967_v31 = vadd.f32 %v935_v14, %v897_v26  ;;  %v1073_v50 = vmul.f32 %v1857_v23, %v2291_v52  ;;  %v588_v35 = vrot.slane %v2377_v61, 7  ;;  %v2407_v5 = vsel %vm665_vm1, %v696_v0, %v697_v53 }
  0x70   : > { %v1379_v7 = vadd.f32 %v1347_v54, %v1310_v17  ;;  %v1173_v36 = vadd.f32 %v1141_v62, %v1104_v2  ;;  %v796_v10 = vmul.f32 %v1831_v9, %v2286_v49  ;;  %v1142_v40 = vmul.f32 %v1866_v28, %v2355_v42 }
  0x71   : > { %v1036_v39 = vadd.f32 %v1004_v46, %v967_v31  ;;  %v2414_v56 = vsel %vm556_vm0, %v587_v6, %v588_v35  ;;  %v866_v43 = vmul.f32 %v1819_v3, %v2350_v55  ;;  %v1211_v58 = vmul.f32 %v1875_v32, %v2279_v21 }
  0x72   : > { %v1418_v57 = vadd.f32 %v1969_v34, %v1379_v7  ;;  %v1242_v47 = vadd.f32 %v1210_v45, %v1173_v36  ;;  %v936_v49 = vmul.f32 %v1839_v13, %v2414_v56  ;;  %v1280_v24 = vmul.f32 %v1880_v33, %v2343_v12 }
  0x73   : > { %v1105_v59 = vadd.f32 %v1073_v50, %v1036_v39  ;;  %v898_v30 = vadd.f32 %v866_v43, %v796_v10  ;;  %v1005_v38 = vmul.f32 %v1845_v18, %v2249_v1  ;;  %v1349_v11 = vmul.f32 %v1889_v37, %v2407_v5  ;;  %v2441_v1 = vld [vmem:[%s1807_s25 + $0xa8] sm:$0xff] }
  0x74   : > { %1451 = vst.msk [vmem:[%s1983_s6 + $0x70] sm:$0xff] %vm1436_vm2, %v1418_v57  ;;  %v1311_v54 = vadd.f32 %v1279_v63, %v1242_v47  ;;  %v1074_v21 = vmul.f32 %v1857_v23, %v2313_v60  ;;  %v590_v6 = vrot.slane %v2419_v44, 7  ;;  %v1143_v62 = vmul.f32 %v1866_v28, %v2377_v61  ;;  %v2483_v47 = vld [vmem:[%s1807_s25 + $0xb0] sm:$0xff] }
  0x75   : > { %v1174_v48 = vadd.f32 %v1142_v40, %v1105_v59  ;;  %v968_v19 = vadd.f32 %v936_v49, %v898_v30  ;;  %v699_v0 = vrot.slane %v2419_v44, 1  ;;  %v797_v22 = vmul.f32 %v1831_v9, %v2316_v20 }
  0x76   : > { %v1380_v8 = vadd.f32 %v1348_v41, %v1311_v54  ;;  %v2444_v27 = vsel %vm556_vm0, 0.0, %v590_v6  ;;  %v867_v29 = vmul.f32 %v1819_v3, %v2380_v25  ;;  %v700_v51 = vrot.slane %v2441_v1, 1 }
  0x77   : > { %v1243_v4 = vadd.f32 %v1211_v58, %v1174_v48  ;;  %v1037_v14 = vadd.f32 %v1005_v38, %v968_v19  ;;  %v937_v26 = vmul.f32 %v1839_v13, %v2444_v27  ;;  %v2455_v17 = vsel %vm665_vm1, %v697_v53, 0.0 }
  0x78   : > { %v1419_v46 = vadd.f32 %v1969_v34, %v1380_v8  ;;  %v899_v2 = vadd.f32 %v867_v29, %v797_v22  ;;  %v1006_v45 = vmul.f32 %v1845_v18, %v2291_v52  ;;  %v1212_v41 = vmul.f32 %v1875_v32, %v2327_v15 }
  0x79   : > { %v1312_v20 = vadd.f32 %v1280_v24, %v1243_v4  ;;  %v1106_v63 = vadd.f32 %v1074_v21, %v1037_v14  ;;  %v1281_v31 = vmul.f32 %v1880_v33, %v2391_v16  ;;  %v1350_v50 = vmul.f32 %v1889_v37, %v2455_v17 }
  0x7a   : > { %1452 = vst.msk [vmem:[%s1983_s6 + $0x78] sm:$0xff] %vm1436_vm2, %v1419_v46  ;;  %v969_v53 = vadd.f32 %v937_v26, %v899_v2  ;;  %v1075_v35 = vmul.f32 %v1857_v23, %v2355_v42  ;;  %v591_v52 = vrot.slane %v2441_v1, 7  ;;  %v2471_v10 = vsel %vm665_vm1, %v699_v0, %v700_v51 }
  0x7b   : > { %v1381_v7 = vadd.f32 %v1349_v11, %v1312_v20  ;;  %v1175_v36 = vadd.f32 %v1143_v62, %v1106_v63  ;;  %v798_v15 = vmul.f32 %v1831_v9, %v2350_v55  ;;  %v1144_v40 = vmul.f32 %v1866_v28, %v2419_v44 }
  0x7c   : > { %v1038_v39 = vadd.f32 %v1006_v45, %v969_v53  ;;  %v2478_v43 = vsel %vm556_vm0, %v590_v6, %v591_v52  ;;  %v868_v57 = vmul.f32 %v1819_v3, %v2414_v56  ;;  %v1213_v59 = vmul.f32 %v1875_v32, %v2343_v12 }
  0x7d   : > { %v1420_v58 = vadd.f32 %v1969_v34, %v1381_v7  ;;  %v1244_v49 = vadd.f32 %v1212_v41, %v1175_v36  ;;  %v938_v55 = vmul.f32 %v1839_v13, %v2478_v43  ;;  %v1282_v30 = vmul.f32 %v1880_v33, %v2407_v5 }
  0x7e   : > { %v1107_v24 = vadd.f32 %v1075_v35, %v1038_v39  ;;  %v900_v38 = vadd.f32 %v868_v57, %v798_v15  ;;  %v1007_v54 = vmul.f32 %v1845_v18, %v2313_v60  ;;  %v1351_v21 = vmul.f32 %v1889_v37, %v2471_v10  ;;  %v2505_v60 = vld [vmem:[%s1807_s25 + $0xb8] sm:$0xff]  ;;  %v2552_v15 = vld [vmem:[%s2931_s3 + $0x4] ss:$0 sm:$0xff] }
  0x7f   : > { %1453 = vst.msk [vmem:[%s1983_s6 + $0x80] sm:$0xff] %vm1436_vm2, %v1420_v58  ;;  %v1313_v11 = vadd.f32 %v1281_v31, %v1244_v49  ;;  %v1076_v12 = vmul.f32 %v1857_v23, %v2377_v61  ;;  %v593_v6 = vrot.slane %v2483_v47, 7  ;;  %v1145_v62 = vmul.f32 %v1866_v28, %v2441_v1 }
  0x80   : > { %v1176_v48 = vadd.f32 %v1144_v40, %v1107_v24  ;;  %v970_v19 = vadd.f32 %v938_v55, %v900_v38  ;;  %v702_v0 = vrot.slane %v2483_v47, 1  ;;  %v799_v29 = vmul.f32 %v1831_v9, %v2380_v25  ;;  %v2557_v40 = vld [vmem:[%s1807_s25 + $0xc0] sm:$0xff] }
  0x81   : > { %v1382_v8 = vadd.f32 %v1350_v50, %v1313_v11  ;;  %v2508_v22 = vsel %vm556_vm0, 0.0, %v593_v6  ;;  %v869_v4 = vmul.f32 %v1819_v3, %v2444_v27  ;;  %v703_v46 = vrot.slane %v2505_v60, 1 }
  0x82   : > { %v1245_v14 = vadd.f32 %v1213_v59, %v1176_v48  ;;  %v1039_v26 = vadd.f32 %v1007_v54, %v970_v19  ;;  %v939_v2 = vmul.f32 %v1839_v13, %v2508_v22  ;;  %v2519_v20 = vsel %vm665_vm1, %v700_v51, 0.0  ;;  %v2599_v19 = vld [vmem:[%s1807_s25 + $0xc8] sm:$0xff] }
  0x83   : > { %v1421_v45 = vadd.f32 %v1969_v34, %v1382_v8  ;;  %v901_v63 = vadd.f32 %v869_v4, %v799_v29  ;;  %v1008_v41 = vmul.f32 %v1845_v18, %v2355_v42  ;;  %v1214_v3 = vmul.f32 %v1875_v32, %v2391_v16  ;;  %v2540_v16 = vld [vmem:[%s2931_s3] ss:$0 sm:$0xff] }
  0x84   : > { %v1314_v9 = vadd.f32 %v1282_v30, %v1245_v14  ;;  %v1108_v25 = vadd.f32 %v1076_v12, %v1039_v26  ;;  %v1283_v31 = vmul.f32 %v1880_v33, %v2455_v17  ;;  %v1352_v13 = vmul.f32 %v1889_v37, %v2519_v20  ;;  %v2574_v30 = vld [vmem:[%s2931_s3 + $0x1] ss:$0 sm:$0xff] }
  0x85   : > { %1454 = vst.msk [vmem:[%s1983_s6 + $0x88] sm:$0xff] %vm1436_vm2, %v1421_v45  ;;  %v971_v51 = vadd.f32 %v939_v2, %v901_v63  ;;  %v1077_v50 = vmul.f32 %v1857_v23, %v2419_v44  ;;  %v594_v18 = vrot.slane %v2505_v60, 7  ;;  %v2535_v35 = vsel %vm665_vm1, %v702_v0, %v703_v46 }
  0x86   : > { %v1383_v42 = vadd.f32 %v1351_v21, %v1314_v9  ;;  %v1177_v53 = vadd.f32 %v1145_v62, %v1108_v25  ;;  %v800_v52 = vmul.f32 %v2540_v16, %v2414_v56  ;;  %v1146_v23 = vmul.f32 %v1866_v28, %v2483_v47  ;;  %v2565_v28 = vld [vmem:[%s2931_s3 + $0x8] ss:$0 sm:$0xff]  ;;  %v2620_v25 = vld [vmem:[%s2931_s3 + $0x2] ss:$0 sm:$0xff] }
  0x87   : > { %v1040_v7 = vadd.f32 %v1008_v41, %v971_v51  ;;  %v2547_v36 = vsel %vm556_vm0, %v593_v6, %v594_v18  ;;  %v870_v39 = vmul.f32 %v2552_v15, %v2478_v43  ;;  %v1215_v58 = vmul.f32 %v1875_v32, %v2407_v5 }
  0x88   : > { %v1422_v56 = vadd.f32 %v1969_v34, %v1383_v42  ;;  %v1246_v57 = vadd.f32 %v1214_v3, %v1177_v53  ;;  %v940_v49 = vmul.f32 %v2565_v28, %v2547_v36  ;;  %v1284_v55 = vmul.f32 %v1880_v33, %v2471_v10  ;;  %v2585_v33 = vld [vmem:[%s2931_s3 + $0x5] ss:$0 sm:$0xff] }
  0x89   : > { %v1109_v59 = vadd.f32 %v1077_v50, %v1040_v7  ;;  %v902_v24 = vadd.f32 %v870_v39, %v800_v52  ;;  %v1009_v32 = vmul.f32 %v2574_v30, %v2377_v61  ;;  %v1353_v38 = vmul.f32 %v1889_v37, %v2535_v35  ;;  %v2593_v61 = vld [vmem:[%s2931_s3 + $0x9] ss:$0 sm:$0xff] }
  0x8a   : > { %1455 = vst.msk [vmem:[%s1983_s6 + $0x90] sm:$0xff] %vm1436_vm2, %v1422_v56  ;;  %v1315_v5 = vadd.f32 %v1283_v31, %v1246_v57  ;;  %v1078_v54 = vmul.f32 %v2585_v33, %v2441_v1  ;;  %v596_v11 = vrot.slane %v2557_v40, 7  ;;  %v1147_v37 = vmul.f32 %v2593_v61, %v2505_v60  ;;  %v2627_v31 = vld [vmem:[%s2931_s3 + $0x6] ss:$0 sm:$0xff]  ;;  %v2656_v57 = vld [vmem:[%s1807_s25 + $0xd0] sm:$0xff] }
  0x8b   : > { %v1178_v21 = vadd.f32 %v1146_v23, %v1109_v59  ;;  %v972_v12 = vadd.f32 %v940_v49, %v902_v24  ;;  %v705_v6 = vrot.slane %v2557_v40, 1  ;;  %v801_v0 = vmul.f32 %v2540_v16, %v2444_v27 }
  0x8c   : > { %v1384_v48 = vadd.f32 %v1352_v13, %v1315_v5  ;;  %v2602_v62 = vsel %vm556_vm0, 0.0, %v596_v11  ;;  %v871_v8 = vmul.f32 %v2552_v15, %v2508_v22  ;;  %v706_v14 = vrot.slane %v2599_v19, 1 }
  0x8d   : > { %v1247_v29 = vadd.f32 %v1215_v58, %v1178_v21  ;;  %v1041_v4 = vadd.f32 %v1009_v32, %v972_v12  ;;  %v941_v26 = vmul.f32 %v2565_v28, %v2602_v62  ;;  %v2613_v45 = vsel %vm665_vm1, %v703_v46, 0.0 }
  0x8e   : > { %v1423_v2 = vadd.f32 %v1969_v34, %v1384_v48  ;;  %v903_v63 = vadd.f32 %v871_v8, %v801_v0  ;;  %v1010_v27 = vmul.f32 %v2574_v30, %v2419_v44  ;;  %v1216_v3 = vmul.f32 %v2620_v25, %v2455_v17  ;;  %v2636_v44 = vld [vmem:[%s2931_s3 + $0xa] ss:$0 sm:$0xff] }
  0x8f   : > { %v1316_v41 = vadd.f32 %v1284_v55, %v1247_v29  ;;  %v1110_v9 = vadd.f32 %v1078_v54, %v1041_v4  ;;  %v1285_v46 = vmul.f32 %v2627_v31, %v2519_v20  ;;  %v1354_v13 = vmul.f32 %v2636_v44, %v2613_v45 }
  0x90   : > { %1456 = vst.msk [vmem:[%s1983_s6 + $0x98] sm:$0xff] %vm1436_vm2, %v1423_v2  ;;  %v973_v17 = vadd.f32 %v941_v26, %v903_v63  ;;  %v1079_v51 = vmul.f32 %v2585_v33, %v2483_v47  ;;  %v597_v50 = vrot.slane %v2599_v19, 7  ;;  %v2644_v53 = vsel %vm665_vm1, %v705_v6, %v706_v14 }
  0x91   : > { %v1385_v18 = vadd.f32 %v1353_v38, %v1316_v41  ;;  %v1179_v42 = vadd.f32 %v1147_v37, %v1110_v9  ;;  %v802_v52 = vmul.f32 %v2540_v16, %v2478_v43  ;;  %v1148_v23 = vmul.f32 %v2593_v61, %v2557_v40 }
  0x92   : > { %v1042_v7 = vadd.f32 %v1010_v27, %v973_v17  ;;  %v2651_v39 = vsel %vm556_vm0, %v596_v11, %v597_v50  ;;  %v872_v56 = vmul.f32 %v2552_v15, %v2547_v36  ;;  %v1217_v59 = vmul.f32 %v2620_v25, %v2471_v10 }
  0x93   : > { %v1424_v58 = vadd.f32 %v1969_v34, %v1385_v18  ;;  %v1248_v49 = vadd.f32 %v1216_v3, %v1179_v42  ;;  %v942_v43 = vmul.f32 %v2565_v28, %v2651_v39  ;;  %v1286_v24 = vmul.f32 %v2627_v31, %v2535_v35 }
  0x94   : > { %v1111_v55 = vadd.f32 %v1079_v51, %v1042_v7  ;;  %v904_v32 = vadd.f32 %v872_v56, %v802_v52  ;;  %v1011_v5 = vmul.f32 %v2574_v30, %v2441_v1  ;;  %v1355_v54 = vmul.f32 %v2636_v44, %v2644_v53  ;;  %v2678_v1 = vld [vmem:[%s1807_s25 + $0xd8] sm:$0xff] }
  0x95   : > { %1457 = vst.msk [vmem:[%s1983_s6 + $0xa0] sm:$0xff] %vm1436_vm2, %v1424_v58  ;;  %v1317_v38 = vadd.f32 %v1285_v46, %v1248_v49  ;;  %v1080_v10 = vmul.f32 %v2585_v33, %v2505_v60  ;;  %v599_v11 = vrot.slane %v2656_v57, 7  ;;  %v1149_v37 = vmul.f32 %v2593_v61, %v2599_v19  ;;  %v2720_v58 = vld [vmem:[%s1807_s25 + $0xe0] sm:$0xff] }
  0x96   : > { %v1180_v21 = vadd.f32 %v1148_v23, %v1111_v55  ;;  %v974_v12 = vadd.f32 %v942_v43, %v904_v32  ;;  %v708_v6 = vrot.slane %v2656_v57, 1  ;;  %v803_v8 = vmul.f32 %v2540_v16, %v2508_v22  ;;  %v2725_v49 = vld [vmem:[%s2932_s4] ss:$0 sm:$0xff] }
  0x97   : > { %v1386_v48 = vadd.f32 %v1354_v13, %v1317_v38  ;;  %v2681_v0 = vsel %vm556_vm0, 0.0, %v599_v11  ;;  %v873_v29 = vmul.f32 %v2552_v15, %v2602_v62  ;;  %v709_v2 = vrot.slane %v2678_v1, 1 }
  0x98   : > { %v1249_v4 = vadd.f32 %v1217_v59, %v1180_v21  ;;  %v1043_v26 = vadd.f32 %v1011_v5, %v974_v12  ;;  %v943_v63 = vmul.f32 %v2565_v28, %v2681_v0  ;;  %v2692_v41 = vsel %vm665_vm1, %v706_v14, 0.0 }
  0x99   : > { %v1425_v27 = vadd.f32 %v1969_v34, %v1386_v48  ;;  %v905_v9 = vadd.f32 %v873_v29, %v803_v8  ;;  %v1012_v3 = vmul.f32 %v2574_v30, %v2483_v47  ;;  %v1218_v13 = vmul.f32 %v2620_v25, %v2519_v20 }
  0x9a   : > { %v1318_v22 = vadd.f32 %v1286_v24, %v1249_v4  ;;  %v1112_v46 = vadd.f32 %v1080_v10, %v1043_v26  ;;  %v1287_v17 = vmul.f32 %v2627_v31, %v2613_v45  ;;  %v1356_v34 = vmul.f32 %v2636_v44, %v2692_v41 }
  0x9b   : > { %1458 = vst.msk [vmem:[%s1983_s6 + $0xa8] sm:$0xff] %vm1436_vm2, %v1425_v27  ;;  %v975_v14 = vadd.f32 %v943_v63, %v905_v9  ;;  %v1081_v51 = vmul.f32 %v2585_v33, %v2557_v40  ;;  %v600_v47 = vrot.slane %v2678_v1, 7  ;;  %v2708_v42 = vsel %vm665_vm1, %v708_v6, %v709_v2 }
  0x9c   : > { %v1387_v50 = vadd.f32 %v1355_v54, %v1318_v22  ;;  %v1181_v18 = vadd.f32 %v1149_v37, %v1112_v46  ;;  %v804_v20 = vmul.f32 %v2540_v16, %v2547_v36  ;;  %v1150_v7 = vmul.f32 %v2593_v61, %v2656_v57 }
  0x9d   : > { %v1044_v52 = vadd.f32 %v1012_v3, %v975_v14  ;;  %v2715_v23 = vsel %vm556_vm0, %v599_v11, %v600_v47  ;;  %v874_v56 = vmul.f32 %v2552_v15, %v2651_v39  ;;  %v1219_v43 = vmul.f32 %v2620_v25, %v2535_v35 }
  0x9e   : > { %v1426_v59 = vadd.f32 %v2725_v49, %v1387_v50  ;;  %v1250_v36 = vadd.f32 %v1218_v13, %v1181_v18  ;;  %v944_v55 = vmul.f32 %v2565_v28, %v2715_v23  ;;  %v1288_v32 = vmul.f32 %v2627_v31, %v2644_v53 }
  0x9f   : > { %v1113_v24 = vadd.f32 %v1081_v51, %v1044_v52  ;;  %v906_v5 = vadd.f32 %v874_v56, %v804_v20  ;;  %v1013_v38 = vmul.f32 %v2574_v30, %v2505_v60  ;;  %v1357_v10 = vmul.f32 %v2636_v44, %v2708_v42  ;;  %v2747_v60 = vld [vmem:[%s1807_s25 + $0xe8] sm:$0xff] }
  0xa0   : > { %1459 = vst.msk [vmem:[%s1983_s6 + $0xb0] sm:$0xff] %vm1436_vm2, %v1426_v59  ;;  %v1319_v54 = vadd.f32 %v1287_v17, %v1250_v36  ;;  %v1082_v35 = vmul.f32 %v2585_v33, %v2599_v19  ;;  %v602_v11 = vrot.slane %v2720_v58, 7  ;;  %v1151_v37 = vmul.f32 %v2593_v61, %v2678_v1  ;;  %v2789_v36 = vld [vmem:[%s1807_s25 + $0xf0] sm:$0xff] }
  0xa1   : > { %v1182_v21 = vadd.f32 %v1150_v7, %v1113_v24  ;;  %v976_v12 = vadd.f32 %v944_v55, %v906_v5  ;;  %v711_v6 = vrot.slane %v2720_v58, 1  ;;  %v805_v29 = vmul.f32 %v2540_v16, %v2602_v62 }
  0xa2   : > { %v1388_v48 = vadd.f32 %v1356_v34, %v1319_v54  ;;  %v2750_v8 = vsel %vm556_vm0, 0.0, %v602_v11  ;;  %v875_v4 = vmul.f32 %v2552_v15, %v2681_v0  ;;  %v712_v27 = vrot.slane %v2747_v60, 1 }
  0xa3   : > { %v1251_v26 = vadd.f32 %v1219_v43, %v1182_v21  ;;  %v1045_v63 = vadd.f32 %v1013_v38, %v976_v12  ;;  %v945_v9 = vmul.f32 %v2565_v28, %v2750_v8  ;;  %v2761_v22 = vsel %vm665_vm1, %v709_v2, 0.0 }
  0xa4   : > { %v1427_v3 = vadd.f32 %v2725_v49, %v1388_v48  ;;  %v907_v46 = vadd.f32 %v875_v4, %v805_v29  ;;  %v1014_v13 = vmul.f32 %v2574_v30, %v2557_v40  ;;  %v1220_v34 = vmul.f32 %v2620_v25, %v2613_v45 }
  0xa5   : > { %v1320_v62 = vadd.f32 %v1288_v32, %v1251_v26  ;;  %v1114_v17 = vadd.f32 %v1082_v35, %v1045_v63  ;;  %v1289_v14 = vmul.f32 %v2627_v31, %v2692_v41  ;;  %v1358_v51 = vmul.f32 %v2636_v44, %v2761_v22 }
  0xa6   : > { %1460 = vst.msk [vmem:[%s1983_s6 + $0xb8] sm:$0xff] %vm1436_vm2, %v1427_v3  ;;  %v977_v2 = vadd.f32 %v945_v9, %v907_v46  ;;  %v1083_v47 = vmul.f32 %v2585_v33, %v2656_v57  ;;  %v603_v40 = vrot.slane %v2747_v60, 7  ;;  %v2777_v20 = vsel %vm665_vm1, %v711_v6, %v712_v27 }
  0xa7   : > { %v1389_v50 = vadd.f32 %v1357_v10, %v1320_v62  ;;  %v1183_v18 = vadd.f32 %v1151_v37, %v1114_v17  ;;  %v806_v45 = vmul.f32 %v2540_v16, %v2651_v39  ;;  %v1152_v7 = vmul.f32 %v2593_v61, %v2720_v58  ;;  %v2801_v10 = vld [vmem:[%s1807_s25 + $0xf8] sm:$0xff]  ;;  %s1692_s25 = sadd.s32 240, %s1801_s22 }
  0xa8   : > { %v1046_v52 = vadd.f32 %v1014_v13, %v977_v2  ;;  %v2784_v56 = vsel %vm556_vm0, %v602_v11, %v603_v40  ;;  %v876_v59 = vmul.f32 %v2552_v15, %v2715_v23  ;;  %v1221_v24 = vmul.f32 %v2620_v25, %v2644_v53  ;;  %s446_s9 = scalar_lea.vmem %s2930_s2, %s1692_s25 }
  0xa9   : > { %v1428_v43 = vadd.f32 %v2725_v49, %v1389_v50  ;;  %v1252_v55 = vadd.f32 %v1220_v34, %v1183_v18  ;;  %v946_v39 = vmul.f32 %v2565_v28, %v2784_v56  ;;  %v1290_v5 = vmul.f32 %v2627_v31, %v2708_v42 }
  0xaa   : > { %v1115_v32 = vadd.f32 %v1083_v47, %v1046_v52  ;;  %v908_v38 = vadd.f32 %v876_v59, %v806_v45  ;;  %v1015_v54 = vmul.f32 %v2574_v30, %v2599_v19  ;;  %v1359_v53 = vmul.f32 %v2636_v44, %v2777_v20 }
  0xab   : > { %1461 = vst.msk [vmem:[%s1983_s6 + $0xc0] sm:$0xff] %vm1436_vm2, %v1428_v43  ;;  %v1321_v35 = vadd.f32 %v1289_v14, %v1252_v55  ;;  %v2808_v11 = vsel %vm665_vm1, %v712_v27, 0.0  ;;  %v605_v21 = vrot.slane %v2789_v36, 7  ;;  %v1084_v6 = vmul.f32 %v2585_v33, %v2678_v1  ;;  %v483_v43 = vld [vmem:[%s446_s9] sm:$0xff] }
  0xac   : > { %v1184_v12 = vadd.f32 %v1152_v7, %v1115_v32  ;;  %v978_v37 = vadd.f32 %v946_v39, %v908_v38  ;;  %v1153_v19 = vmul.f32 %v2593_v61, %v2747_v60  ;;  %v606_v29 = vrot.slane %v2801_v10, 7 }
  0xad   : > { %v1390_v48 = vadd.f32 %v1358_v51, %v1321_v35  ;;  %v663_v4 = vsel %vm556_vm0, 0.0, %v605_v21  ;;  %v807_v26 = vmul.f32 %v2540_v16, %v2681_v0  ;;  %v877_v9 = vmul.f32 %v2552_v15, %v2750_v8 }
  0xae   : > { %v1253_v63 = vadd.f32 %v1221_v24, %v1184_v12  ;;  %v1047_v27 = vadd.f32 %v1015_v54, %v978_v37  ;;  %v947_v3 = vmul.f32 %v2565_v28, %v663_v4  ;;  %v1222_v13 = vmul.f32 %v2620_v25, %v2692_v41 }
  0xaf   : > { %v1429_v46 = vadd.f32 %v2725_v49, %v1390_v48  ;;  %v714_v62 = vrot.slane %v2789_v36, 1  ;;  %v715_v17 = vrot.slane %v2801_v10, 1  ;;  %v909_v0 = vadd.f32 %v877_v9, %v807_v26 }
  0xb0   : > { %v1322_v34 = vadd.f32 %v1290_v5, %v1253_v63  ;;  %v1116_v14 = vadd.f32 %v1084_v6, %v1047_v27  ;;  %v1016_v51 = vmul.f32 %v2574_v30, %v2656_v57  ;;  %v1291_v2 = vmul.f32 %v2627_v31, %v2761_v22  ;;  %v484_v5 = vld [vmem:[%s446_s9 + $0x8] sm:$0xff] }
  0xb1   : > { %1462 = vst.msk [vmem:[%s1983_s6 + $0xc8] sm:$0xff] %vm1436_vm2, %v1429_v46  ;;  %v1360_v41 = vmul.f32 %v2636_v44, %v2808_v11  ;;  %v1085_v47 = vmul.f32 %v2585_v33, %v2720_v58  ;;  %v979_v18 = vadd.f32 %v947_v3, %v909_v0  ;;  %v607_v57 = vsel %vm556_vm0, %v605_v21, %v606_v29 }
  0xb2   : > { %v1391_v40 = vadd.f32 %v1359_v53, %v1322_v34  ;;  %v1185_v50 = vadd.f32 %v1153_v19, %v1116_v14  ;;  %v2843_v45 = vsel %vm665_vm1, %v714_v62, %v715_v17  ;;  %v808_v52 = vmul.f32 %v2540_v16, %v2715_v23 }
  0xb3   : > { %v878_v7 = vmul.f32 %v2552_v15, %v2784_v56  ;;  %v948_v59 = vmul.f32 %v2565_v28, %v607_v57  ;;  %v1048_v39 = vadd.f32 %v1016_v51, %v979_v18  ;;  %v1154_v32 = vmul.f32 %v2593_v61, %v2789_v36 }
  0xb4   : > { %v1430_v55 = vadd.f32 %v2725_v49, %v1391_v40  ;;  %v1254_v24 = vadd.f32 %v1222_v13, %v1185_v50  ;;  %v1223_v38 = vmul.f32 %v2620_v25, %v2708_v42  ;;  %v1292_v23 = vmul.f32 %v2627_v31, %v2777_v20 }
  0xb5   : > { %v910_v54 = vadd.f32 %v878_v7, %v808_v52  ;;  %v1017_v35 = vmul.f32 %v2574_v30, %v2678_v1  ;;  %v1117_v21 = vadd.f32 %v1085_v47, %v1048_v39  ;;  %v1086_v12 = vmul.f32 %v2585_v33, %v2747_v60 }
  0xb6   : > { %1463 = vst.msk [vmem:[%s1983_s6 + $0xd0] sm:$0xff] %vm1436_vm2, %v1430_v55  ;;  %v1323_v53 = vadd.f32 %v1291_v2, %v1254_v24  ;;  %v486_v37 = vmul.f32 0.0, %v483_v43  ;;  %v487_v19 = vmul.f32 0.0, %v484_v5  ;;  %v809_v42 = vmul.f32 %v2540_v16, %v2750_v8 }
  0xb7   : > { %v980_v6 = vadd.f32 %v948_v59, %v910_v54  ;;  %v879_v48 = vmul.f32 %v2552_v15, %v663_v4  ;;  %v1186_v26 = vadd.f32 %v1154_v32, %v1117_v21  ;;  %v1361_v1 = vmul.f32 %v2636_v44, %v2843_v45 }
  0xb8   : > { %v1392_v29 = vadd.f32 %v1360_v41, %v1323_v53  ;;  %v608_v63 = vrot.slane %v486_v37, 7  ;;  %v1155_v9 = vmul.f32 %v2593_v61, %v2801_v10  ;;  %v609_v3 = vrot.slane %v487_v19, 7 }
  0xb9   : > { %v1049_v27 = vadd.f32 %v1017_v35, %v980_v6  ;;  %v911_v46 = vadd.f32 %v879_v48, %v809_v42  ;;  %v1255_v62 = vadd.f32 %v1223_v38, %v1186_v26  ;;  %v772_v8 = vsel %vm665_vm1, %v715_v17, 0.0 }
  0xba   : > { %v1431_v13 = vadd.f32 %v2725_v49, %v1392_v29  ;;  %v664_v4 = vsel %vm556_vm0, 0.0, %v608_v63  ;;  %v1224_v14 = vmul.f32 %v2620_v25, %v2761_v22  ;;  %v1018_v51 = vmul.f32 %v2574_v30, %v2720_v58 }
  0xbb   : > { %v1118_v34 = vadd.f32 %v1086_v12, %v1049_v27  ;;  %v949_v0 = vmul.f32 %v2565_v28, %v664_v4  ;;  %v1324_v2 = vadd.f32 %v1292_v23, %v1255_v62  ;;  %v1293_v41 = vmul.f32 %v2627_v31, %v2808_v11 }
  0xbc   : > { %1464 = vst.msk [vmem:[%s1983_s6 + $0xd8] sm:$0xff] %vm1436_vm2, %v1431_v13  ;;  %v1362_v47 = vmul.f32 %v2636_v44, %v772_v8  ;;  %v717_v17 = vrot.slane %v486_v37, 1  ;;  %v1087_v18 = vmul.f32 %v2585_v33, %v2789_v36  ;;  %v610_v22 = vsel %vm556_vm0, %v608_v63, %v609_v3 }
  0xbd   : > { %v1187_v40 = vadd.f32 %v1155_v9, %v1118_v34  ;;  %v981_v50 = vadd.f32 %v949_v0, %v911_v46  ;;  %v1393_v52 = vadd.f32 %v1361_v1, %v1324_v2  ;;  %v718_v7 = vrot.slane %v487_v19, 1 }
  0xbe   : > { %v810_v58 = vmul.f32 %v2540_v16, %v2784_v56  ;;  %v880_v59 = vmul.f32 %v2552_v15, %v607_v57  ;;  %v1156_v24 = vmul.f32 %v2593_v61, %v486_v37  ;;  %v950_v39 = vmul.f32 %v2565_v28, %v610_v22 }
  0xbf   : > { %v1256_v43 = vadd.f32 %v1224_v14, %v1187_v40  ;;  %v1050_v55 = vadd.f32 %v1018_v51, %v981_v50  ;;  %v1432_v32 = vadd.f32 %v2725_v49, %v1393_v52  ;;  %v1019_v36 = vmul.f32 %v2574_v30, %v2747_v60 }
  0xc0   : > { %v912_v5 = vadd.f32 %v880_v59, %v810_v58  ;;  %v1225_v16 = vmul.f32 %v2620_v25, %v2777_v20  ;;  %v719_v15 = vsel %vm665_vm1, %v717_v17, %v718_v7  ;;  %v1088_v28 = vmul.f32 %v2585_v33, %v2801_v10 }
  0xc1   : > { %v1325_v38 = vadd.f32 %v1293_v41, %v1256_v43  ;;  %v1119_v23 = vadd.f32 %v1087_v18, %v1050_v55  ;;  %1465 = vst.msk [vmem:[%s1983_s6 + $0xe0] sm:$0xff] %vm1436_vm2, %v1432_v32  ;;  %v1294_v35 = vmul.f32 %v2627_v31, %v2843_v45  ;;  %v1157_v60 = vmul.f32 %v2593_v61, %v487_v19 }
  0xc2   : > { %v982_v56 = vadd.f32 %v950_v39, %v912_v5  ;;  %v1363_v21 = vmul.f32 %v2636_v44, %v719_v15  ;;  %v1226_v37 = vmul.f32 %v2620_v25, %v2808_v11  ;;  %v773_v10 = vsel %vm665_vm1, %v718_v7, 0.0 }
  0xc3   : > { %v1394_v57 = vadd.f32 %v1362_v47, %v1325_v38  ;;  %v1188_v54 = vadd.f32 %v1156_v24, %v1119_v23  ;;  %v1295_v6 = vmul.f32 %v2627_v31, %v772_v8  ;;  %v1364_v42 = vmul.f32 %v2636_v44, %v773_v10 }
  0xc4   : > { %v1051_v30 = vadd.f32 %v1019_v36, %v982_v56 }
  0xc5   : > { %v1433_v53 = vadd.f32 %v2725_v49, %v1394_v57  ;;  %v1257_v20 = vadd.f32 %v1225_v16, %v1188_v54 }
  0xc6   : > { %v1120_v12 = vadd.f32 %v1088_v28, %v1051_v30 }
  0xc7   : > { %1466 = vst.msk [vmem:[%s1983_s6 + $0xe8] sm:$0xff] %vm1436_vm2, %v1433_v53  ;;  %v1326_v33 = vadd.f32 %v1294_v35, %v1257_v20 }
  0xc8   : > { %v1189_v45 = vadd.f32 %v1157_v60, %v1120_v12 }
  0xc9   : > { %v1395_v61 = vadd.f32 %v1363_v21, %v1326_v33 }
  0xca   : > { %v1258_v19 = vadd.f32 %v1226_v37, %v1189_v45 }
  0xcb   : > { %v1434_v48 = vadd.f32 %v2725_v49, %v1395_v61 }
  0xcc   : > { %v1327_v29 = vadd.f32 %v1295_v6, %v1258_v19 }
  0xcd   : > { %1467 = vst.msk [vmem:[%s1983_s6 + $0xf0] sm:$0xff] %vm1436_vm2, %v1434_v48 }
  0xce   : > { %v1396_v26 = vadd.f32 %v1364_v42, %v1327_v29 }
  0xd0   : > { %v1435_v25 = vadd.f32 %v2725_v49, %v1396_v26 }
  0xd2   : > { %1468 = vst.msk [vmem:[%s1983_s6 + $0xf8] sm:$0xff] %vm1436_vm2, %v1435_v25 }
  0xd3 PF: > { %s15_s20 = sadd.s32 1, %s1751_s20   ;;  %s2934_s18 = smov %s1747_s19 }
  0xd4   : > { %p12_p5 = scmp.ge.s32.totalorder %s15_s20, 4   ;;  %s2935_s19 = smov %s2937_s21 }
  0xd6   :  { %14 = sbr.rel (!%p12_p5) target bundleno = 2 (0x2), region = 84 }

</bundles_post_ra>
